<compile_context>
chip_gen: v7x
topology: tpu7x:2x2x1
jax: 0.10.0
libtpu: 0.0.40
codegen_flags: <defaults>
</compile_context>

<pallas_src>
import functools

import jax
import jax.numpy as jnp
from jax.experimental import pallas as pl
from jax.experimental.pallas import tpu as pltpu

BN_EPS = 1e-5


def _default_vmem_limit():
    """Generation-aware VMEM budget: ~75% of physical, capped at 100 MiB."""
    try:
        info = pltpu.get_tpu_info()
        cap = getattr(info, "vmem_capacity_bytes", None)
        if isinstance(cap, int) and cap > 0:
            return int(min(0.75 * cap, 100 * 1024 * 1024))
    except Exception:
        pass
    return 48 * 1024 * 1024          # safe default (v7x has 64 MiB physical)


_VMEM_LIMIT = _default_vmem_limit()


def _round_up(x, m):
    return ((x + m - 1) // m) * m


def _pick_deconv_tile(m_padded, cin, cout4, vmem_limit):
    """Largest lane tile (multiple of 128, divides m_padded) whose double-
    buffered working set fits the budget; prefer >=8 (else >=2) grid steps."""
    budget = max(vmem_limit // 3, 1 << 20)
    fitting = [t for t in (8192, 4096, 2048, 1024, 512, 256, 128)
               if m_padded % t == 0 and 4 * t * (cin + cout4) <= budget]
    if not fitting:
        return 128 if m_padded % 128 == 0 else m_padded
    for min_steps in (8, 2, 1):
        for t in fitting:                        # sorted large -> small
            if m_padded // t >= min_steps:
                return t
    return fitting[-1]


def _pick_bn_tile(pv, cout, vmem_limit):
    """Largest lane tile (multiple of 128, divides pv) for the elementwise pass."""
    budget = max(vmem_limit // 2, 1 << 20)
    for t in (8192, 4096, 2048, 1024, 512, 256, 128):
        if pv % t == 0 and 2 * cout * t * 6 <= budget:
            return t
    return pv                                     # full dim (always legal)


# ------------------------- Pallas kernels ------------------------------------

def _deconv_kernel(x_ref, w_ref, b_ref, o_ref):
    # (4*Cout, Cin)bf16 @ (Cin, TM)bf16 -> fp32 acc, + per-row bias, store bf16.
    acc = jnp.dot(w_ref[...], x_ref[...], preferred_element_type=jnp.float32)
    o_ref[...] = (acc + b_ref[...]).astype(o_ref.dtype)


def _conv_stats_kernel(x_ref, w_ref, b_ref, msk_ref, y_ref, st_ref, *,
                       Wp, W2, H2, packed, n_valid):
    # x_ref : (Cout, L)         bf16  one padded image, pixels row-major, width Wp
    # w_ref : (3, Cout, 3*Cout) or (9, Cout, Cout)   bf16
    # b_ref : (Cout, 1)         f32   conv bias
    # msk_ref: (1, H2*Wp)       f32   1.0 on valid window positions
    # y_ref : (Cout, H2*W2)     bf16  conv+bias output, garbage columns dropped
    # st_ref: (Cout, 2)         f32   [:,0]=per-image mean, [:,1]=centered sum sq
    cout = y_ref.shape[0]
    lwin = H2 * Wp

    def tap(di, dj):
        off = di * Wp + dj                       # static lane offset of this tap
        return x_ref[:, off:off + lwin]

    n_groups = 3 if packed else 9
    acc = None
    for g in range(n_groups):
        if packed:
            # K-pack the 3 column taps of kernel row g: K = 3*Cout per matmul.
            parts = [tap(g, dj) for dj in range(3)]
            if cout % 16 != 0:
                # robust sublane-concat path for non-bf16-aligned row counts
                parts = [p.astype(jnp.float32) for p in parts]
                xt = jnp.concatenate(parts, axis=0).astype(x_ref.dtype)
            else:
                xt = jnp.concatenate(parts, axis=0)
        else:
            di, dj = divmod(g, 3)
            xt = tap(di, dj)
        t = jnp.dot(w_ref[g], xt, preferred_element_type=jnp.float32)
        acc = (t + b_ref[...]) if g == 0 else (acc + t)

    # per-image BN partial stats over VALID pixels (precomputed 0/1 mask)
    mask = msk_ref[...]
    s = jnp.sum(acc * mask, axis=1, keepdims=True)
    m = s * (1.0 / n_valid)
    d = (acc - m) * mask                         # centered -> no cancellation
    ssq = jnp.sum(d * d, axis=1, keepdims=True)
    st_ref[...] = jnp.concatenate([m, ssq], axis=1)

    # fused crop: store only the W2 valid columns of each of the H2 rows (bf16)
    # TODO(synk): switch to a row-tiled grid for very large H2 (unroll bloat).
    for r in range(H2):
        y_ref[:, r * W2:(r + 1) * W2] = acc[:, r * Wp:r * Wp + W2].astype(y_ref.dtype)


def _bn_relu_kernel(y_ref, sc_ref, sh_ref, o_ref):
    y = y_ref[...].astype(jnp.float32)
    o_ref[...] = jnp.maximum(y * sc_ref[...] + sh_ref[...], 0.0)


# ------------------------- wrapper -------------------------------------------

def deconv2d_block(x, wd, bd, wc, bc, gamma, beta):
    """Deconv2DBlock forward.  x: (N, Cin, H, W) f32 -> (N, Cout, 2H, 2W) f32."""
    N, Cin, H, W = x.shape
    Cout = wd.shape[1]
    H2, W2 = 2 * H, 2 * W
    Wp = W2 + 2                    # width padded 1 left + 1 right
    L = (H2 + 3) * Wp              # rows padded 1 top + 2 bottom (flat-tap slack)
    Lwin = H2 * Wp                 # window positions (incl. 2 garbage cols/row)
    PV = H2 * W2                   # valid output pixels per image
    M1 = N * H * W

    # ---- stage 1: ConvTranspose2d(k=2, s=2) as a lane-dense tiled matmul ----
    xT = jnp.transpose(x, (1, 0, 2, 3)).reshape(Cin, M1).astype(jnp.bfloat16)
    M1p = _round_up(M1, 128)
    if M1p != M1:
        xT = jnp.pad(xT, ((0, 0), (0, M1p - M1)))
    wT = jnp.transpose(wd, (1, 2, 3, 0)).reshape(4 * Cout, Cin).astype(jnp.bfloat16)
    brow = jnp.repeat(bd, 4).reshape(4 * Cout, 1).astype(jnp.float32)

    tm = _pick_deconv_tile(M1p, Cin, 4 * Cout, _VMEM_LIMIT)
    ydT = pl.pallas_call(
        _deconv_kernel,
        out_shape=jax.ShapeDtypeStruct((4 * Cout, M1p), jnp.bfloat16),
        grid=(M1p // tm,),
        in_specs=[
            pl.BlockSpec((Cin, tm), lambda i: (0, i)),
            pl.BlockSpec((4 * Cout, Cin), lambda i: (0, 0)),
            pl.BlockSpec((4 * Cout, 1), lambda i: (0, 0)),
        ],
        out_specs=pl.BlockSpec((4 * Cout, tm), lambda i: (0, i)),
        compiler_params=pltpu.CompilerParams(
            dimension_semantics=("parallel",), vmem_limit_bytes=_VMEM_LIMIT),
        cost_estimate=pl.CostEstimate(
            flops=2 * M1p * Cin * 4 * Cout, transcendentals=0,
            bytes_accessed=(M1p * Cin + 4 * Cout * Cin + 4 * Cout * M1p) * 2),
    )(xT, wT, brow)
    if M1p != M1:
        ydT = ydT[:, :M1]

    # 2x2 sub-pixel scatter + pad for the 3x3 conv (bf16 XLA glue).
    # TODO(synk): fuse this reorganisation into the kernels (sub-pixel-conv identity).
    x1 = ydT.reshape(Cout, 2, 2, N, H, W).transpose(3, 0, 4, 1, 5, 2)
    x1 = x1.reshape(N, Cout, H2, W2)
    xp = jnp.pad(x1, ((0, 0), (0, 0), (1, 2), (1, 1)))        # (N, Cout, H2+3, Wp)
    xpf = xp.reshape(N, Cout, L)

    # ---- stage 2, pass A: 3x3 conv + bias + per-image BN partial stats ------
    packed = Cout <= 128           # K-pack taps (3 matmuls, K=3*Cout) when useful
    if packed:
        # wck[di][o, dj*Cout + c] = wc[o, c, di, dj]
        wck = jnp.transpose(wc, (2, 0, 3, 1)).reshape(3, Cout, 3 * Cout)
    else:
        # wck[di*3+dj][o, c] = wc[o, c, di, dj]
        wck = jnp.transpose(wc, (2, 3, 0, 1)).reshape(9, Cout, Cout)
    wck = wck.astype(jnp.bfloat16)
    bc2 = bc.reshape(Cout, 1).astype(jnp.float32)
    mask = (jnp.arange(Lwin, dtype=jnp.int32) % Wp < W2)
    mask = mask.astype(jnp.float32).reshape(1, Lwin)

    kern = functools.partial(_conv_stats_kernel, Wp=Wp, W2=W2, H2=H2,
                             packed=packed, n_valid=float(PV))
    convf, stats = pl.pallas_call(
        kern,
        out_shape=(jax.ShapeDtypeStruct((N, Cout, PV), jnp.bfloat16),
                   jax.ShapeDtypeStruct((N, Cout, 2), jnp.float32)),
        grid=(N,),
        in_specs=[
            pl.BlockSpec((None, Cout, L), lambda n: (n, 0, 0)),
            pl.BlockSpec(wck.shape, lambda n: (0, 0, 0)),
            pl.BlockSpec((Cout, 1), lambda n: (0, 0)),
            pl.BlockSpec((1, Lwin), lambda n: (0, 0)),
        ],
        out_specs=(pl.BlockSpec((None, Cout, PV), lambda n: (n, 0, 0)),
                   pl.BlockSpec((None, Cout, 2), lambda n: (n, 0, 0))),
        compiler_params=pltpu.CompilerParams(
            dimension_semantics=("parallel",), vmem_limit_bytes=_VMEM_LIMIT),
        cost_estimate=pl.CostEstimate(
            flops=2 * 9 * Cout * Cout * Lwin * N, transcendentals=0,
            bytes_accessed=N * (Cout * L * 2 + Cout * PV * 2 + Lwin * 4)
                           + 9 * Cout * Cout * 2),
    )(xpf, wck, bc2, mask)

    # combine per-image stats (parallel-variance formula; numerically robust)
    m_n = stats[:, :, 0]                                      # (N, Cout)
    ss_n = stats[:, :, 1]
    cnt = float(PV)
    mean = jnp.mean(m_n, axis=0)                              # (Cout,)
    var = (jnp.sum(ss_n, axis=0)
           + cnt * jnp.sum((m_n - mean) ** 2, axis=0)) / (N * cnt)
    inv = jax.lax.rsqrt(var + BN_EPS)
    scale = (gamma * inv).reshape(Cout, 1).astype(jnp.float32)
    shift = (beta - mean * gamma * inv).reshape(Cout, 1).astype(jnp.float32)

    # ---- stage 2, pass B: BN affine + ReLU, lane-dense flat tiles -----------
    tl = _pick_bn_tile(PV, Cout, _VMEM_LIMIT)
    yb = pl.pallas_call(
        _bn_relu_kernel,
        out_shape=jax.ShapeDtypeStruct((N, Cout, PV), jnp.float32),
        grid=(N, PV // tl),
        in_specs=[
            pl.BlockSpec((None, Cout, tl), lambda n, p: (n, 0, p)),
            pl.BlockSpec((Cout, 1), lambda n, p: (0, 0)),
            pl.BlockSpec((Cout, 1), lambda n, p: (0, 0)),
        ],
        out_specs=pl.BlockSpec((None, Cout, tl), lambda n, p: (n, 0, p)),
        compiler_params=pltpu.CompilerParams(
            dimension_semantics=("parallel", "parallel"),
            vmem_limit_bytes=_VMEM_LIMIT),
        cost_estimate=pl.CostEstimate(
            flops=2 * N * Cout * PV, transcendentals=0,
            bytes_accessed=N * Cout * PV * (2 + 4)),
    )(convf, scale, shift)

    # layout-preserving (free) reshape to the final NCHW image shape
    return yb.reshape(N, Cout, H2, W2)


# ------------------------- pure-JAX references --------------------------------

def reference(x, wd, bd, wc, bc, gamma, beta):
    """fp32 reference (matches PyTorch forward, training-mode BN)."""
    N, Cin, H, W = x.shape
    Cout = wd.shape[1]
    t = jnp.einsum('ncij,coab->noiajb', x, wd)
    x1 = t.reshape(N, Cout, 2 * H, 2 * W) + bd[None, :, None, None]
    x2 = jax.lax.conv_general_dilated(
        x1, wc, window_strides=(1, 1), padding=((1, 1), (1, 1)),
        dimension_numbers=('NCHW', 'OIHW', 'NCHW'))
    x2 = x2 + bc[None, :, None, None]
    mean = jnp.mean(x2, axis=(0, 2, 3), keepdims=True)
    var = jnp.mean((x2 - mean) ** 2, axis=(0, 2, 3), keepdims=True)
    y = (x2 - mean) * jax.lax.rsqrt(var + BN_EPS)
    y = y * gamma[None, :, None, None] + beta[None, :, None, None]
    return jnp.maximum(y, 0.0)


def reference_bf16(x, wd, bd, wc, bc, gamma, beta):
    """Reference mirroring the kernel's bf16-matmul / fp32-accumulate path and
    the bf16 storage of the conv intermediate."""
    N, Cin, H, W = x.shape
    Cout = wd.shape[1]
    t = jnp.einsum('ncij,coab->noiajb', x.astype(jnp.bfloat16),
                   wd.astype(jnp.bfloat16), preferred_element_type=jnp.float32)
    x1 = t.reshape(N, Cout, 2 * H, 2 * W) + bd[None, :, None, None]
    x1 = x1.astype(jnp.bfloat16)
    x2 = jax.lax.conv_general_dilated(
        x1, wc.astype(jnp.bfloat16), window_strides=(1, 1),
        padding=((1, 1), (1, 1)), dimension_numbers=('NCHW', 'OIHW', 'NCHW'),
        preferred_element_type=jnp.float32)
    x2 = x2 + bc[None, :, None, None]
    mean = jnp.mean(x2, axis=(0, 2, 3), keepdims=True)
    var = jnp.mean((x2 - mean) ** 2, axis=(0, 2, 3), keepdims=True)
    x2q = x2.astype(jnp.bfloat16).astype(jnp.float32)   # bf16-stored intermediate
    y = (x2q - mean) * jax.lax.rsqrt(var + BN_EPS)
    y = y * gamma[None, :, None, None] + beta[None, :, None, None]
    return jnp.maximum(y, 0.0)


# ------------------------- main ----------------------------------------------

if __name__ == "__main__":
    key = jax.random.PRNGKey(0)
    N, Cin, Cout, H, W = 2, 4, 8, 16, 16
    ks = jax.random.split(key, 7)

    x = jax.random.normal(ks[0], (N, Cin, H, W), jnp.float32)
    # ConvTranspose2d weight: (in_planes, out_planes, 2, 2) + bias (out_planes,)
    wd = 0.2 * jax.random.normal(ks[1], (Cin, Cout, 2, 2), jnp.float32)
    bd = 0.1 * jax.random.normal(ks[2], (Cout,), jnp.float32)
    # Conv2d weight: (out_planes, out_planes, 3, 3) + bias (out_planes,)
    wc = 0.1 * jax.random.normal(ks[3], (Cout, Cout, 3, 3), jnp.float32)
    bc = 0.1 * jax.random.normal(ks[4], (Cout,), jnp.float32)
    # BatchNorm2d affine params
    gamma = 1.0 + 0.1 * jax.random.normal(ks[5], (Cout,), jnp.float32)
    beta = 0.1 * jax.random.normal(ks[6], (Cout,), jnp.float32)

    out = jax.jit(deconv2d_block)(x, wd, bd, wc, bc, gamma, beta)
    out = jax.block_until_ready(out)
    assert out.shape == (N, Cout, 2 * H, 2 * W), out.shape

    # tight check vs a reference that mirrors the kernel's bf16 precision path
    ref_b = reference_bf16(x, wd, bd, wc, bc, gamma, beta)
    err_b = float(jnp.max(jnp.abs(out - ref_b)))
    assert err_b < 1e-2, f"bf16-matched max abs err {err_b}"

    # looser check vs the full fp32 reference (bound set by bf16 roundings)
    ref_f = reference(x, wd, bd, wc, bc, gamma, beta)
    err_f = float(jnp.max(jnp.abs(out - ref_f)))
    assert err_f < 5e-2, f"fp32-reference max abs err {err_f}"

    print("KERNEL_OK")
</pallas_src>

<mosaic_0001>
module attributes {stable_mosaic.version = 11 : i64} {
  func.func @_deconv_kernel(%arg0: i32, %arg1: memref<4x256xbf16, #tpu.memory_space<vmem>>, %arg2: memref<32x4xbf16, #tpu.memory_space<vmem>>, %arg3: memref<32x1xf32, #tpu.memory_space<vmem>>, %arg4: memref<32x256xbf16, #tpu.memory_space<vmem>>) attributes {dimension_semantics = [#tpu.dimension_semantics<parallel>], iteration_bounds = array<i64: 2>, scalar_prefetch = 0 : i64, scratch_operands = 0 : i64, tpu.core_type = #tpu.core_type<tc>, window_params = [{transform_indices = @transform_0, window_bounds = array<i64: 4, 256>}, {pipeline_mode = #tpu.pipeline_mode<synchronous>, transform_indices = @transform_1, window_bounds = array<i64: 32, 4>}, {pipeline_mode = #tpu.pipeline_mode<synchronous>, transform_indices = @transform_2, window_bounds = array<i64: 32, 1>}, {transform_indices = @transform_3, window_bounds = array<i64: 32, 256>}]} {
    %c0 = arith.constant 0 : index
    %c0_0 = arith.constant 0 : index
    %0 = vector.load %arg2[%c0, %c0_0] : memref<32x4xbf16, #tpu.memory_space<vmem>>, vector<32x4xbf16>
    %c0_1 = arith.constant 0 : index
    %c0_2 = arith.constant 0 : index
    %1 = vector.load %arg1[%c0_1, %c0_2] : memref<4x256xbf16, #tpu.memory_space<vmem>>, vector<4x256xbf16>
    %cst = arith.constant dense<0.000000e+00> : vector<32x256xf32>
    %2 = tpu.matmul %0, %1, %cst {dimension_numbers = #tpu.dot_dimension_numbers<[1], [0], [0], [1], [0, 0, 1, 1], [], []>} : vector<32x4xbf16>, vector<4x256xbf16>, vector<32x256xf32> -> vector<32x256xf32>
    %c0_3 = arith.constant 0 : index
    %c0_4 = arith.constant 0 : index
    %3 = vector.load %arg3[%c0_3, %c0_4] : memref<32x1xf32, #tpu.memory_space<vmem>>, vector<32x1xf32>
    %4 = vector.broadcast %3 : vector<32x1xf32> to vector<32x256xf32>
    %5 = arith.addf %2, %4 : vector<32x256xf32>
    %6 = arith.truncf %5 : vector<32x256xf32> to vector<32x256xbf16>
    %c0_5 = arith.constant 0 : index
    %c0_6 = arith.constant 0 : index
    %7 = vector.load %arg4[%c0_5, %c0_6] : memref<32x256xbf16, #tpu.memory_space<vmem>>, vector<32x256xbf16>
    tpu.vector_store %arg4[%c0_5, %c0_6], %6 {strides = array<i32>} : memref<32x256xbf16, #tpu.memory_space<vmem>>, vector<32x256xbf16>,
    return
  }
  func.func @transform_0(%arg0: i32) -> (i32, i32) {
    %c0_i32 = arith.constant 0 : i32
    %c0_i32_0 = arith.constant 0 : i32
    return %c0_i32, %arg0 : i32, i32
  }
  func.func @transform_1(%arg0: i32) -> (i32, i32) {
    %c0_i32 = arith.constant 0 : i32
    %c0_i32_0 = arith.constant 0 : i32
    %c0_i32_1 = arith.constant 0 : i32
    return %c0_i32, %c0_i32_0 : i32, i32
  }
  func.func @transform_2(%arg0: i32) -> (i32, i32) {
    %c0_i32 = arith.constant 0 : i32
    %c0_i32_0 = arith.constant 0 : i32
    %c0_i32_1 = arith.constant 0 : i32
    return %c0_i32, %c0_i32_0 : i32, i32
  }
  func.func @transform_3(%arg0: i32) -> (i32, i32) {
    %c0_i32 = arith.constant 0 : i32
    %c0_i32_0 = arith.constant 0 : i32
    return %c0_i32, %arg0 : i32, i32
  }
}

module attributes {stable_mosaic.version = 11 : i64} {
  func.func @_conv_stats_kernel(%arg0: i32, %arg1: memref<1x8x1190xbf16, #tpu.memory_space<vmem>>, %arg2: memref<3x8x24xbf16, #tpu.memory_space<vmem>>, %arg3: memref<8x1xf32, #tpu.memory_space<vmem>>, %arg4: memref<1x1088xf32, #tpu.memory_space<vmem>>, %arg5: memref<1x8x1024xbf16, #tpu.memory_space<vmem>>, %arg6: memref<1x8x2xf32, #tpu.memory_space<vmem>>) attributes {dimension_semantics = [#tpu.dimension_semantics<parallel>], iteration_bounds = array<i64: 2>, scalar_prefetch = 0 : i64, scratch_operands = 0 : i64, tpu.core_type = #tpu.core_type<tc>, window_params = [{transform_indices = @transform_0, window_bounds = array<i64: 1, 8, 1190>}, {pipeline_mode = #tpu.pipeline_mode<synchronous>, transform_indices = @transform_1, window_bounds = array<i64: 3, 8, 24>}, {pipeline_mode = #tpu.pipeline_mode<synchronous>, transform_indices = @transform_2, window_bounds = array<i64: 8, 1>}, {pipeline_mode = #tpu.pipeline_mode<synchronous>, transform_indices = @transform_3, window_bounds = array<i64: 1, 1088>}, {transform_indices = @transform_4, window_bounds = array<i64: 1, 8, 1024>}, {transform_indices = @transform_5, window_bounds = array<i64: 1, 8, 2>}]} {
    %c0 = arith.constant 0 : index
    %c0_0 = arith.constant 0 : index
    %c0_1 = arith.constant 0 : index
    %0 = vector.load %arg1[%c0, %c0_0, %c0_1] : memref<1x8x1190xbf16, #tpu.memory_space<vmem>>, vector<1x8x1088xbf16>
    %1 = vector.shape_cast %0 : vector<1x8x1088xbf16> to vector<8x1088xbf16>
    %c0_2 = arith.constant 0 : index
    %c0_3 = arith.constant 0 : index
    %c1 = arith.constant 1 : index
    %2 = vector.load %arg1[%c0_2, %c0_3, %c1] : memref<1x8x1190xbf16, #tpu.memory_space<vmem>>, vector<1x8x1088xbf16>
    %3 = vector.shape_cast %2 : vector<1x8x1088xbf16> to vector<8x1088xbf16>
    %c0_4 = arith.constant 0 : index
    %c0_5 = arith.constant 0 : index
    %c2 = arith.constant 2 : index
    %4 = vector.load %arg1[%c0_4, %c0_5, %c2] : memref<1x8x1190xbf16, #tpu.memory_space<vmem>>, vector<1x8x1088xbf16>
    %5 = vector.shape_cast %4 : vector<1x8x1088xbf16> to vector<8x1088xbf16>
    %6 = arith.extf %1 : vector<8x1088xbf16> to vector<8x1088xf32>
    %7 = arith.extf %3 : vector<8x1088xbf16> to vector<8x1088xf32>
    %8 = arith.extf %5 : vector<8x1088xbf16> to vector<8x1088xf32>
    %9 = tpu.concatenate %6, %7, %8 in 0 : vector<8x1088xf32>, vector<8x1088xf32>, vector<8x1088xf32> -> vector<24x1088xf32>
    %10 = arith.truncf %9 : vector<24x1088xf32> to vector<24x1088xbf16>
    %c0_6 = arith.constant 0 : index
    %c0_7 = arith.constant 0 : index
    %c0_8 = arith.constant 0 : index
    %11 = vector.load %arg2[%c0_6, %c0_7, %c0_8] : memref<3x8x24xbf16, #tpu.memory_space<vmem>>, vector<1x8x24xbf16>
    %12 = vector.shape_cast %11 : vector<1x8x24xbf16> to vector<8x24xbf16>
    %cst = arith.constant dense<0.000000e+00> : vector<8x1088xf32>
    %13 = tpu.matmul %12, %10, %cst {dimension_numbers = #tpu.dot_dimension_numbers<[1], [0], [0], [1], [0, 0, 1, 1], [], []>} : vector<8x24xbf16>, vector<24x1088xbf16>, vector<8x1088xf32> -> vector<8x1088xf32>
    %c0_9 = arith.constant 0 : index
    %c0_10 = arith.constant 0 : index
    %14 = vector.load %arg3[%c0_9, %c0_10] : memref<8x1xf32, #tpu.memory_space<vmem>>, vector<8x1xf32>
    %15 = vector.broadcast %14 : vector<8x1xf32> to vector<8x1088xf32>
    %16 = arith.addf %13, %15 : vector<8x1088xf32>
    %c0_11 = arith.constant 0 : index
    %c0_12 = arith.constant 0 : index
    %c34 = arith.constant 34 : index
    %17 = vector.load %arg1[%c0_11, %c0_12, %c34] : memref<1x8x1190xbf16, #tpu.memory_space<vmem>>, vector<1x8x1088xbf16>
    %18 = vector.shape_cast %17 : vector<1x8x1088xbf16> to vector<8x1088xbf16>
    %c0_13 = arith.constant 0 : index
    %c0_14 = arith.constant 0 : index
    %c35 = arith.constant 35 : index
    %19 = vector.load %arg1[%c0_13, %c0_14, %c35] : memref<1x8x1190xbf16, #tpu.memory_space<vmem>>, vector<1x8x1088xbf16>
    %20 = vector.shape_cast %19 : vector<1x8x1088xbf16> to vector<8x1088xbf16>
    %c0_15 = arith.constant 0 : index
    %c0_16 = arith.constant 0 : index
    %c36 = arith.constant 36 : index
    %21 = vector.load %arg1[%c0_15, %c0_16, %c36] : memref<1x8x1190xbf16, #tpu.memory_space<vmem>>, vector<1x8x1088xbf16>
    %22 = vector.shape_cast %21 : vector<1x8x1088xbf16> to vector<8x1088xbf16>
    %23 = arith.extf %18 : vector<8x1088xbf16> to vector<8x1088xf32>
    %24 = arith.extf %20 : vector<8x1088xbf16> to vector<8x1088xf32>
    %25 = arith.extf %22 : vector<8x1088xbf16> to vector<8x1088xf32>
    %26 = tpu.concatenate %23, %24, %25 in 0 : vector<8x1088xf32>, vector<8x1088xf32>, vector<8x1088xf32> -> vector<24x1088xf32>
    %27 = arith.truncf %26 : vector<24x1088xf32> to vector<24x1088xbf16>
    %c1_17 = arith.constant 1 : index
    %c0_18 = arith.constant 0 : index
    %c0_19 = arith.constant 0 : index
    %28 = vector.load %arg2[%c1_17, %c0_18, %c0_19] : memref<3x8x24xbf16, #tpu.memory_space<vmem>>, vector<1x8x24xbf16>
    %29 = vector.shape_cast %28 : vector<1x8x24xbf16> to vector<8x24xbf16>
    %cst_20 = arith.constant dense<0.000000e+00> : vector<8x1088xf32>
    %30 = tpu.matmul %29, %27, %cst_20 {dimension_numbers = #tpu.dot_dimension_numbers<[1], [0], [0], [1], [0, 0, 1, 1], [], []>} : vector<8x24xbf16>, vector<24x1088xbf16>, vector<8x1088xf32> -> vector<8x1088xf32>
    %31 = arith.addf %16, %30 : vector<8x1088xf32>
    %c0_21 = arith.constant 0 : index
    %c0_22 = arith.constant 0 : index
    %c68 = arith.constant 68 : index
    %32 = vector.load %arg1[%c0_21, %c0_22, %c68] : memref<1x8x1190xbf16, #tpu.memory_space<vmem>>, vector<1x8x1088xbf16>
    %33 = vector.shape_cast %32 : vector<1x8x1088xbf16> to vector<8x1088xbf16>
    %c0_23 = arith.constant 0 : index
    %c0_24 = arith.constant 0 : index
    %c69 = arith.constant 69 : index
    %34 = vector.load %arg1[%c0_23, %c0_24, %c69] : memref<1x8x1190xbf16, #tpu.memory_space<vmem>>, vector<1x8x1088xbf16>
    %35 = vector.shape_cast %34 : vector<1x8x1088xbf16> to vector<8x1088xbf16>
    %c0_25 = arith.constant 0 : index
    %c0_26 = arith.constant 0 : index
    %c70 = arith.constant 70 : index
    %36 = vector.load %arg1[%c0_25, %c0_26, %c70] : memref<1x8x1190xbf16, #tpu.memory_space<vmem>>, vector<1x8x1088xbf16>
    %37 = vector.shape_cast %36 : vector<1x8x1088xbf16> to vector<8x1088xbf16>
    %38 = arith.extf %33 : vector<8x1088xbf16> to vector<8x1088xf32>
    %39 = arith.extf %35 : vector<8x1088xbf16> to vector<8x1088xf32>
    %40 = arith.extf %37 : vector<8x1088xbf16> to vector<8x1088xf32>
    %41 = tpu.concatenate %38, %39, %40 in 0 : vector<8x1088xf32>, vector<8x1088xf32>, vector<8x1088xf32> -> vector<24x1088xf32>
    %42 = arith.truncf %41 : vector<24x1088xf32> to vector<24x1088xbf16>
    %c2_27 = arith.constant 2 : index
    %c0_28 = arith.constant 0 : index
    %c0_29 = arith.constant 0 : index
    %43 = vector.load %arg2[%c2_27, %c0_28, %c0_29] : memref<3x8x24xbf16, #tpu.memory_space<vmem>>, vector<1x8x24xbf16>
    %44 = vector.shape_cast %43 : vector<1x8x24xbf16> to vector<8x24xbf16>
    %cst_30 = arith.constant dense<0.000000e+00> : vector<8x1088xf32>
    %45 = tpu.matmul %44, %42, %cst_30 {dimension_numbers = #tpu.dot_dimension_numbers<[1], [0], [0], [1], [0, 0, 1, 1], [], []>} : vector<8x24xbf16>, vector<24x1088xbf16>, vector<8x1088xf32> -> vector<8x1088xf32>
    %46 = arith.addf %31, %45 : vector<8x1088xf32>
    %c0_31 = arith.constant 0 : index
    %c0_32 = arith.constant 0 : index
    %47 = vector.load %arg4[%c0_31, %c0_32] : memref<1x1088xf32, #tpu.memory_space<vmem>>, vector<1x1088xf32>
    %48 = vector.broadcast %47 : vector<1x1088xf32> to vector<8x1088xf32>
    %49 = arith.mulf %46, %48 : vector<8x1088xf32>
    %cst_33 = arith.constant dense<0.000000e+00> : vector<8xf32>
    %50 = vector.multi_reduction <add>, %49, %cst_33 [1] : vector<8x1088xf32> to vector<8xf32>
    %51 = vector.shape_cast %50 : vector<8xf32> to vector<8x1xf32>
    %cst_34 = arith.constant 9.765625E-4 : f32
    %52 = vector.broadcast %cst_34 : f32 to vector<8x1xf32>
    %53 = arith.mulf %51, %52 : vector<8x1xf32>
    %54 = vector.broadcast %53 : vector<8x1xf32> to vector<8x1088xf32>
    %55 = arith.subf %46, %54 : vector<8x1088xf32>
    %56 = vector.broadcast %47 : vector<1x1088xf32> to vector<8x1088xf32>
    %57 = arith.mulf %55, %56 : vector<8x1088xf32>
    %58 = arith.mulf %57, %57 : vector<8x1088xf32>
    %cst_35 = arith.constant dense<0.000000e+00> : vector<8xf32>
    %59 = vector.multi_reduction <add>, %58, %cst_35 [1] : vector<8x1088xf32> to vector<8xf32>
    %60 = vector.shape_cast %59 : vector<8xf32> to vector<8x1xf32>
    %61 = tpu.concatenate %53, %60 in 1 : vector<8x1xf32>, vector<8x1xf32> -> vector<8x2xf32>
    %c0_36 = arith.constant 0 : index
    %c0_37 = arith.constant 0 : index
    %c0_38 = arith.constant 0 : index
    %62 = vector.load %arg6[%c0_36, %c0_37, %c0_38] : memref<1x8x2xf32, #tpu.memory_space<vmem>>, vector<1x8x2xf32>
    %63 = vector.shape_cast %62 : vector<1x8x2xf32> to vector<8x2xf32>
    %64 = vector.shape_cast %61 : vector<8x2xf32> to vector<1x8x2xf32>
    tpu.vector_store %arg6[%c0_36, %c0_37, %c0_38], %64 {strides = array<i32>} : memref<1x8x2xf32, #tpu.memory_space<vmem>>, vector<1x8x2xf32>,
    %65 = vector.extract_strided_slice %46 {offsets = [0, 0], sizes = [8, 32], strides = [1, 1]} : vector<8x1088xf32> to vector<8x32xf32>
    %66 = arith.truncf %65 : vector<8x32xf32> to vector<8x32xbf16>
    %c0_39 = arith.constant 0 : index
    %c0_40 = arith.constant 0 : index
    %c0_41 = arith.constant 0 : index
    %67 = vector.load %arg5[%c0_39, %c0_40, %c0_41] : memref<1x8x1024xbf16, #tpu.memory_space<vmem>>, vector<1x8x32xbf16>
    %68 = vector.shape_cast %67 : vector<1x8x32xbf16> to vector<8x32xbf16>
    %69 = vector.shape_cast %66 : vector<8x32xbf16> to vector<1x8x32xbf16>
    tpu.vector_store %arg5[%c0_39, %c0_40, %c0_41], %69 {strides = array<i32>} : memref<1x8x1024xbf16, #tpu.memory_space<vmem>>, vector<1x8x32xbf16>,
    %70 = vector.extract_strided_slice %46 {offsets = [0, 34], sizes = [8, 32], strides = [1, 1]} : vector<8x1088xf32> to vector<8x32xf32>
    %71 = arith.truncf %70 : vector<8x32xf32> to vector<8x32xbf16>
    %c0_42 = arith.constant 0 : index
    %c0_43 = arith.constant 0 : index
    %c32 = arith.constant 32 : index
    %72 = vector.load %arg5[%c0_42, %c0_43, %c32] : memref<1x8x1024xbf16, #tpu.memory_space<vmem>>, vector<1x8x32xbf16>
    %73 = vector.shape_cast %72 : vector<1x8x32xbf16> to vector<8x32xbf16>
    %74 = vector.shape_cast %71 : vector<8x32xbf16> to vector<1x8x32xbf16>
    tpu.vector_store %arg5[%c0_42, %c0_43, %c32], %74 {strides = array<i32>} : memref<1x8x1024xbf16, #tpu.memory_space<vmem>>, vector<1x8x32xbf16>,
    %75 = vector.extract_strided_slice %46 {offsets = [0, 68], sizes = [8, 32], strides = [1, 1]} : vector<8x1088xf32> to vector<8x32xf32>
    %76 = arith.truncf %75 : vector<8x32xf32> to vector<8x32xbf16>
    %c0_44 = arith.constant 0 : index
    %c0_45 = arith.constant 0 : index
    %c64 = arith.constant 64 : index
    %77 = vector.load %arg5[%c0_44, %c0_45, %c64] : memref<1x8x1024xbf16, #tpu.memory_space<vmem>>, vector<1x8x32xbf16>
    %78 = vector.shape_cast %77 : vector<1x8x32xbf16> to vector<8x32xbf16>
    %79 = vector.shape_cast %76 : vector<8x32xbf16> to vector<1x8x32xbf16>
    tpu.vector_store %arg5[%c0_44, %c0_45, %c64], %79 {strides = array<i32>} : memref<1x8x1024xbf16, #tpu.memory_space<vmem>>, vector<1x8x32xbf16>,
    %80 = vector.extract_strided_slice %46 {offsets = [0, 102], sizes = [8, 32], strides = [1, 1]} : vector<8x1088xf32> to vector<8x32xf32>
    %81 = arith.truncf %80 : vector<8x32xf32> to vector<8x32xbf16>
    %c0_46 = arith.constant 0 : index
    %c0_47 = arith.constant 0 : index
    %c96 = arith.constant 96 : index
    %82 = vector.load %arg5[%c0_46, %c0_47, %c96] : memref<1x8x1024xbf16, #tpu.memory_space<vmem>>, vector<1x8x32xbf16>
    %83 = vector.shape_cast %82 : vector<1x8x32xbf16> to vector<8x32xbf16>
    %84 = vector.shape_cast %81 : vector<8x32xbf16> to vector<1x8x32xbf16>
    tpu.vector_store %arg5[%c0_46, %c0_47, %c96], %84 {strides = array<i32>} : memref<1x8x1024xbf16, #tpu.memory_space<vmem>>, vector<1x8x32xbf16>,
    %85 = vector.extract_strided_slice %46 {offsets = [0, 136], sizes = [8, 32], strides = [1, 1]} : vector<8x1088xf32> to vector<8x32xf32>
    %86 = arith.truncf %85 : vector<8x32xf32> to vector<8x32xbf16>
    %c0_48 = arith.constant 0 : index
    %c0_49 = arith.constant 0 : index
    %c128 = arith.constant 128 : index
    %87 = vector.load %arg5[%c0_48, %c0_49, %c128] : memref<1x8x1024xbf16, #tpu.memory_space<vmem>>, vector<1x8x32xbf16>
    %88 = vector.shape_cast %87 : vector<1x8x32xbf16> to vector<8x32xbf16>
    %89 = vector.shape_cast %86 : vector<8x32xbf16> to vector<1x8x32xbf16>
    tpu.vector_store %arg5[%c0_48, %c0_49, %c128], %89 {strides = array<i32>} : memref<1x8x1024xbf16, #tpu.memory_space<vmem>>, vector<1x8x32xbf16>,
    %90 = vector.extract_strided_slice %46 {offsets = [0, 170], sizes = [8, 32], strides = [1, 1]} : vector<8x1088xf32> to vector<8x32xf32>
    %91 = arith.truncf %90 : vector<8x32xf32> to vector<8x32xbf16>
    %c0_50 = arith.constant 0 : index
    %c0_51 = arith.constant 0 : index
    %c160 = arith.constant 160 : index
    %92 = vector.load %arg5[%c0_50, %c0_51, %c160] : memref<1x8x1024xbf16, #tpu.memory_space<vmem>>, vector<1x8x32xbf16>
    %93 = vector.shape_cast %92 : vector<1x8x32xbf16> to vector<8x32xbf16>
    %94 = vector.shape_cast %91 : vector<8x32xbf16> to vector<1x8x32xbf16>
    tpu.vector_store %arg5[%c0_50, %c0_51, %c160], %94 {strides = array<i32>} : memref<1x8x1024xbf16, #tpu.memory_space<vmem>>, vector<1x8x32xbf16>,
    %95 = vector.extract_strided_slice %46 {offsets = [0, 204], sizes = [8, 32], strides = [1, 1]} : vector<8x1088xf32> to vector<8x32xf32>
    %96 = arith.truncf %95 : vector<8x32xf32> to vector<8x32xbf16>
    %c0_52 = arith.constant 0 : index
    %c0_53 = arith.constant 0 : index
    %c192 = arith.constant 192 : index
    %97 = vector.load %arg5[%c0_52, %c0_53, %c192] : memref<1x8x1024xbf16, #tpu.memory_space<vmem>>, vector<1x8x32xbf16>
    %98 = vector.shape_cast %97 : vector<1x8x32xbf16> to vector<8x32xbf16>
    %99 = vector.shape_cast %96 : vector<8x32xbf16> to vector<1x8x32xbf16>
    tpu.vector_store %arg5[%c0_52, %c0_53, %c192], %99 {strides = array<i32>} : memref<1x8x1024xbf16, #tpu.memory_space<vmem>>, vector<1x8x32xbf16>,
    %100 = vector.extract_strided_slice %46 {offsets = [0, 238], sizes = [8, 32], strides = [1, 1]} : vector<8x1088xf32> to vector<8x32xf32>
    %101 = arith.truncf %100 : vector<8x32xf32> to vector<8x32xbf16>
    %c0_54 = arith.constant 0 : index
    %c0_55 = arith.constant 0 : index
    %c224 = arith.constant 224 : index
    %102 = vector.load %arg5[%c0_54, %c0_55, %c224] : memref<1x8x1024xbf16, #tpu.memory_space<vmem>>, vector<1x8x32xbf16>
    %103 = vector.shape_cast %102 : vector<1x8x32xbf16> to vector<8x32xbf16>
    %104 = vector.shape_cast %101 : vector<8x32xbf16> to vector<1x8x32xbf16>
    tpu.vector_store %arg5[%c0_54, %c0_55, %c224], %104 {strides = array<i32>} : memref<1x8x1024xbf16, #tpu.memory_space<vmem>>, vector<1x8x32xbf16>,
    %105 = vector.extract_strided_slice %46 {offsets = [0, 272], sizes = [8, 32], strides = [1, 1]} : vector<8x1088xf32> to vector<8x32xf32>
    %106 = arith.truncf %105 : vector<8x32xf32> to vector<8x32xbf16>
    %c0_56 = arith.constant 0 : index
    %c0_57 = arith.constant 0 : index
    %c256 = arith.constant 256 : index
    %107 = vector.load %arg5[%c0_56, %c0_57, %c256] : memref<1x8x1024xbf16, #tpu.memory_space<vmem>>, vector<1x8x32xbf16>
    %108 = vector.shape_cast %107 : vector<1x8x32xbf16> to vector<8x32xbf16>
    %109 = vector.shape_cast %106 : vector<8x32xbf16> to vector<1x8x32xbf16>
    tpu.vector_store %arg5[%c0_56, %c0_57, %c256], %109 {strides = array<i32>} : memref<1x8x1024xbf16, #tpu.memory_space<vmem>>, vector<1x8x32xbf16>,
    %110 = vector.extract_strided_slice %46 {offsets = [0, 306], sizes = [8, 32], strides = [1, 1]} : vector<8x1088xf32> to vector<8x32xf32>
    %111 = arith.truncf %110 : vector<8x32xf32> to vector<8x32xbf16>
    %c0_58 = arith.constant 0 : index
    %c0_59 = arith.constant 0 : index
    %c288 = arith.constant 288 : index
    %112 = vector.load %arg5[%c0_58, %c0_59, %c288] : memref<1x8x1024xbf16, #tpu.memory_space<vmem>>, vector<1x8x32xbf16>
    %113 = vector.shape_cast %112 : vector<1x8x32xbf16> to vector<8x32xbf16>
    %114 = vector.shape_cast %111 : vector<8x32xbf16> to vector<1x8x32xbf16>
    tpu.vector_store %arg5[%c0_58, %c0_59, %c288], %114 {strides = array<i32>} : memref<1x8x1024xbf16, #tpu.memory_space<vmem>>, vector<1x8x32xbf16>,
    %115 = vector.extract_strided_slice %46 {offsets = [0, 340], sizes = [8, 32], strides = [1, 1]} : vector<8x1088xf32> to vector<8x32xf32>
    %116 = arith.truncf %115 : vector<8x32xf32> to vector<8x32xbf16>
    %c0_60 = arith.constant 0 : index
    %c0_61 = arith.constant 0 : index
    %c320 = arith.constant 320 : index
    %117 = vector.load %arg5[%c0_60, %c0_61, %c320] : memref<1x8x1024xbf16, #tpu.memory_space<vmem>>, vector<1x8x32xbf16>
    %118 = vector.shape_cast %117 : vector<1x8x32xbf16> to vector<8x32xbf16>
    %119 = vector.shape_cast %116 : vector<8x32xbf16> to vector<1x8x32xbf16>
    tpu.vector_store %arg5[%c0_60, %c0_61, %c320], %119 {strides = array<i32>} : memref<1x8x1024xbf16, #tpu.memory_space<vmem>>, vector<1x8x32xbf16>,
    %120 = vector.extract_strided_slice %46 {offsets = [0, 374], sizes = [8, 32], strides = [1, 1]} : vector<8x1088xf32> to vector<8x32xf32>
    %121 = arith.truncf %120 : vector<8x32xf32> to vector<8x32xbf16>
    %c0_62 = arith.constant 0 : index
    %c0_63 = arith.constant 0 : index
    %c352 = arith.constant 352 : index
    %122 = vector.load %arg5[%c0_62, %c0_63, %c352] : memref<1x8x1024xbf16, #tpu.memory_space<vmem>>, vector<1x8x32xbf16>
    %123 = vector.shape_cast %122 : vector<1x8x32xbf16> to vector<8x32xbf16>
    %124 = vector.shape_cast %121 : vector<8x32xbf16> to vector<1x8x32xbf16>
    tpu.vector_store %arg5[%c0_62, %c0_63, %c352], %124 {strides = array<i32>} : memref<1x8x1024xbf16, #tpu.memory_space<vmem>>, vector<1x8x32xbf16>,
    %125 = vector.extract_strided_slice %46 {offsets = [0, 408], sizes = [8, 32], strides = [1, 1]} : vector<8x1088xf32> to vector<8x32xf32>
    %126 = arith.truncf %125 : vector<8x32xf32> to vector<8x32xbf16>
    %c0_64 = arith.constant 0 : index
    %c0_65 = arith.constant 0 : index
    %c384 = arith.constant 384 : index
    %127 = vector.load %arg5[%c0_64, %c0_65, %c384] : memref<1x8x1024xbf16, #tpu.memory_space<vmem>>, vector<1x8x32xbf16>
    %128 = vector.shape_cast %127 : vector<1x8x32xbf16> to vector<8x32xbf16>
    %129 = vector.shape_cast %126 : vector<8x32xbf16> to vector<1x8x32xbf16>
    tpu.vector_store %arg5[%c0_64, %c0_65, %c384], %129 {strides = array<i32>} : memref<1x8x1024xbf16, #tpu.memory_space<vmem>>, vector<1x8x32xbf16>,
    %130 = vector.extract_strided_slice %46 {offsets = [0, 442], sizes = [8, 32], strides = [1, 1]} : vector<8x1088xf32> to vector<8x32xf32>
    %131 = arith.truncf %130 : vector<8x32xf32> to vector<8x32xbf16>
    %c0_66 = arith.constant 0 : index
    %c0_67 = arith.constant 0 : index
    %c416 = arith.constant 416 : index
    %132 = vector.load %arg5[%c0_66, %c0_67, %c416] : memref<1x8x1024xbf16, #tpu.memory_space<vmem>>, vector<1x8x32xbf16>
    %133 = vector.shape_cast %132 : vector<1x8x32xbf16> to vector<8x32xbf16>
    %134 = vector.shape_cast %131 : vector<8x32xbf16> to vector<1x8x32xbf16>
    tpu.vector_store %arg5[%c0_66, %c0_67, %c416], %134 {strides = array<i32>} : memref<1x8x1024xbf16, #tpu.memory_space<vmem>>, vector<1x8x32xbf16>,
    %135 = vector.extract_strided_slice %46 {offsets = [0, 476], sizes = [8, 32], strides = [1, 1]} : vector<8x1088xf32> to vector<8x32xf32>
    %136 = arith.truncf %135 : vector<8x32xf32> to vector<8x32xbf16>
    %c0_68 = arith.constant 0 : index
    %c0_69 = arith.constant 0 : index
    %c448 = arith.constant 448 : index
    %137 = vector.load %arg5[%c0_68, %c0_69, %c448] : memref<1x8x1024xbf16, #tpu.memory_space<vmem>>, vector<1x8x32xbf16>
    %138 = vector.shape_cast %137 : vector<1x8x32xbf16> to vector<8x32xbf16>
    %139 = vector.shape_cast %136 : vector<8x32xbf16> to vector<1x8x32xbf16>
    tpu.vector_store %arg5[%c0_68, %c0_69, %c448], %139 {strides = array<i32>} : memref<1x8x1024xbf16, #tpu.memory_space<vmem>>, vector<1x8x32xbf16>,
    %140 = vector.extract_strided_slice %46 {offsets = [0, 510], sizes = [8, 32], strides = [1, 1]} : vector<8x1088xf32> to vector<8x32xf32>
    %141 = arith.truncf %140 : vector<8x32xf32> to vector<8x32xbf16>
    %c0_70 = arith.constant 0 : index
    %c0_71 = arith.constant 0 : index
    %c480 = arith.constant 480 : index
    %142 = vector.load %arg5[%c0_70, %c0_71, %c480] : memref<1x8x1024xbf16, #tpu.memory_space<vmem>>, vector<1x8x32xbf16>
    %143 = vector.shape_cast %142 : vector<1x8x32xbf16> to vector<8x32xbf16>
    %144 = vector.shape_cast %141 : vector<8x32xbf16> to vector<1x8x32xbf16>
    tpu.vector_store %arg5[%c0_70, %c0_71, %c480], %144 {strides = array<i32>} : memref<1x8x1024xbf16, #tpu.memory_space<vmem>>, vector<1x8x32xbf16>,
    %145 = vector.extract_strided_slice %46 {offsets = [0, 544], sizes = [8, 32], strides = [1, 1]} : vector<8x1088xf32> to vector<8x32xf32>
    %146 = arith.truncf %145 : vector<8x32xf32> to vector<8x32xbf16>
    %c0_72 = arith.constant 0 : index
    %c0_73 = arith.constant 0 : index
    %c512 = arith.constant 512 : index
    %147 = vector.load %arg5[%c0_72, %c0_73, %c512] : memref<1x8x1024xbf16, #tpu.memory_space<vmem>>, vector<1x8x32xbf16>
    %148 = vector.shape_cast %147 : vector<1x8x32xbf16> to vector<8x32xbf16>
    %149 = vector.shape_cast %146 : vector<8x32xbf16> to vector<1x8x32xbf16>
    tpu.vector_store %arg5[%c0_72, %c0_73, %c512], %149 {strides = array<i32>} : memref<1x8x1024xbf16, #tpu.memory_space<vmem>>, vector<1x8x32xbf16>,
    %150 = vector.extract_strided_slice %46 {offsets = [0, 578], sizes = [8, 32], strides = [1, 1]} : vector<8x1088xf32> to vector<8x32xf32>
    %151 = arith.truncf %150 : vector<8x32xf32> to vector<8x32xbf16>
    %c0_74 = arith.constant 0 : index
    %c0_75 = arith.constant 0 : index
    %c544 = arith.constant 544 : index
    %152 = vector.load %arg5[%c0_74, %c0_75, %c544] : memref<1x8x1024xbf16, #tpu.memory_space<vmem>>, vector<1x8x32xbf16>
    %153 = vector.shape_cast %152 : vector<1x8x32xbf16> to vector<8x32xbf16>
    %154 = vector.shape_cast %151 : vector<8x32xbf16> to vector<1x8x32xbf16>
    tpu.vector_store %arg5[%c0_74, %c0_75, %c544], %154 {strides = array<i32>} : memref<1x8x1024xbf16, #tpu.memory_space<vmem>>, vector<1x8x32xbf16>,
    %155 = vector.extract_strided_slice %46 {offsets = [0, 612], sizes = [8, 32], strides = [1, 1]} : vector<8x1088xf32> to vector<8x32xf32>
    %156 = arith.truncf %155 : vector<8x32xf32> to vector<8x32xbf16>
    %c0_76 = arith.constant 0 : index
    %c0_77 = arith.constant 0 : index
    %c576 = arith.constant 576 : index
    %157 = vector.load %arg5[%c0_76, %c0_77, %c576] : memref<1x8x1024xbf16, #tpu.memory_space<vmem>>, vector<1x8x32xbf16>
    %158 = vector.shape_cast %157 : vector<1x8x32xbf16> to vector<8x32xbf16>
    %159 = vector.shape_cast %156 : vector<8x32xbf16> to vector<1x8x32xbf16>
    tpu.vector_store %arg5[%c0_76, %c0_77, %c576], %159 {strides = array<i32>} : memref<1x8x1024xbf16, #tpu.memory_space<vmem>>, vector<1x8x32xbf16>,
    %160 = vector.extract_strided_slice %46 {offsets = [0, 646], sizes = [8, 32], strides = [1, 1]} : vector<8x1088xf32> to vector<8x32xf32>
    %161 = arith.truncf %160 : vector<8x32xf32> to vector<8x32xbf16>
    %c0_78 = arith.constant 0 : index
    %c0_79 = arith.constant 0 : index
    %c608 = arith.constant 608 : index
    %162 = vector.load %arg5[%c0_78, %c0_79, %c608] : memref<1x8x1024xbf16, #tpu.memory_space<vmem>>, vector<1x8x32xbf16>
    %163 = vector.shape_cast %162 : vector<1x8x32xbf16> to vector<8x32xbf16>
    %164 = vector.shape_cast %161 : vector<8x32xbf16> to vector<1x8x32xbf16>
    tpu.vector_store %arg5[%c0_78, %c0_79, %c608], %164 {strides = array<i32>} : memref<1x8x1024xbf16, #tpu.memory_space<vmem>>, vector<1x8x32xbf16>,
    %165 = vector.extract_strided_slice %46 {offsets = [0, 680], sizes = [8, 32], strides = [1, 1]} : vector<8x1088xf32> to vector<8x32xf32>
    %166 = arith.truncf %165 : vector<8x32xf32> to vector<8x32xbf16>
    %c0_80 = arith.constant 0 : index
    %c0_81 = arith.constant 0 : index
    %c640 = arith.constant 640 : index
    %167 = vector.load %arg5[%c0_80, %c0_81, %c640] : memref<1x8x1024xbf16, #tpu.memory_space<vmem>>, vector<1x8x32xbf16>
    %168 = vector.shape_cast %167 : vector<1x8x32xbf16> to vector<8x32xbf16>
    %169 = vector.shape_cast %166 : vector<8x32xbf16> to vector<1x8x32xbf16>
    tpu.vector_store %arg5[%c0_80, %c0_81, %c640], %169 {strides = array<i32>} : memref<1x8x1024xbf16, #tpu.memory_space<vmem>>, vector<1x8x32xbf16>,
    %170 = vector.extract_strided_slice %46 {offsets = [0, 714], sizes = [8, 32], strides = [1, 1]} : vector<8x1088xf32> to vector<8x32xf32>
    %171 = arith.truncf %170 : vector<8x32xf32> to vector<8x32xbf16>
    %c0_82 = arith.constant 0 : index
    %c0_83 = arith.constant 0 : index
    %c672 = arith.constant 672 : index
    %172 = vector.load %arg5[%c0_82, %c0_83, %c672] : memref<1x8x1024xbf16, #tpu.memory_space<vmem>>, vector<1x8x32xbf16>
    %173 = vector.shape_cast %172 : vector<1x8x32xbf16> to vector<8x32xbf16>
    %174 = vector.shape_cast %171 : vector<8x32xbf16> to vector<1x8x32xbf16>
    tpu.vector_store %arg5[%c0_82, %c0_83, %c672], %174 {strides = array<i32>} : memref<1x8x1024xbf16, #tpu.memory_space<vmem>>, vector<1x8x32xbf16>,
    %175 = vector.extract_strided_slice %46 {offsets = [0, 748], sizes = [8, 32], strides = [1, 1]} : vector<8x1088xf32> to vector<8x32xf32>
    %176 = arith.truncf %175 : vector<8x32xf32> to vector<8x32xbf16>
    %c0_84 = arith.constant 0 : index
    %c0_85 = arith.constant 0 : index
    %c704 = arith.constant 704 : index
    %177 = vector.load %arg5[%c0_84, %c0_85, %c704] : memref<1x8x1024xbf16, #tpu.memory_space<vmem>>, vector<1x8x32xbf16>
    %178 = vector.shape_cast %177 : vector<1x8x32xbf16> to vector<8x32xbf16>
    %179 = vector.shape_cast %176 : vector<8x32xbf16> to vector<1x8x32xbf16>
    tpu.vector_store %arg5[%c0_84, %c0_85, %c704], %179 {strides = array<i32>} : memref<1x8x1024xbf16, #tpu.memory_space<vmem>>, vector<1x8x32xbf16>,
    %180 = vector.extract_strided_slice %46 {offsets = [0, 782], sizes = [8, 32], strides = [1, 1]} : vector<8x1088xf32> to vector<8x32xf32>
    %181 = arith.truncf %180 : vector<8x32xf32> to vector<8x32xbf16>
    %c0_86 = arith.constant 0 : index
    %c0_87 = arith.constant 0 : index
    %c736 = arith.constant 736 : index
    %182 = vector.load %arg5[%c0_86, %c0_87, %c736] : memref<1x8x1024xbf16, #tpu.memory_space<vmem>>, vector<1x8x32xbf16>
    %183 = vector.shape_cast %182 : vector<1x8x32xbf16> to vector<8x32xbf16>
    %184 = vector.shape_cast %181 : vector<8x32xbf16> to vector<1x8x32xbf16>
    tpu.vector_store %arg5[%c0_86, %c0_87, %c736], %184 {strides = array<i32>} : memref<1x8x1024xbf16, #tpu.memory_space<vmem>>, vector<1x8x32xbf16>,
    %185 = vector.extract_strided_slice %46 {offsets = [0, 816], sizes = [8, 32], strides = [1, 1]} : vector<8x1088xf32> to vector<8x32xf32>
    %186 = arith.truncf %185 : vector<8x32xf32> to vector<8x32xbf16>
    %c0_88 = arith.constant 0 : index
    %c0_89 = arith.constant 0 : index
    %c768 = arith.constant 768 : index
    %187 = vector.load %arg5[%c0_88, %c0_89, %c768] : memref<1x8x1024xbf16, #tpu.memory_space<vmem>>, vector<1x8x32xbf16>
    %188 = vector.shape_cast %187 : vector<1x8x32xbf16> to vector<8x32xbf16>
    %189 = vector.shape_cast %186 : vector<8x32xbf16> to vector<1x8x32xbf16>
    tpu.vector_store %arg5[%c0_88, %c0_89, %c768], %189 {strides = array<i32>} : memref<1x8x1024xbf16, #tpu.memory_space<vmem>>, vector<1x8x32xbf16>,
    %190 = vector.extract_strided_slice %46 {offsets = [0, 850], sizes = [8, 32], strides = [1, 1]} : vector<8x1088xf32> to vector<8x32xf32>
    %191 = arith.truncf %190 : vector<8x32xf32> to vector<8x32xbf16>
    %c0_90 = arith.constant 0 : index
    %c0_91 = arith.constant 0 : index
    %c800 = arith.constant 800 : index
    %192 = vector.load %arg5[%c0_90, %c0_91, %c800] : memref<1x8x1024xbf16, #tpu.memory_space<vmem>>, vector<1x8x32xbf16>
    %193 = vector.shape_cast %192 : vector<1x8x32xbf16> to vector<8x32xbf16>
    %194 = vector.shape_cast %191 : vector<8x32xbf16> to vector<1x8x32xbf16>
    tpu.vector_store %arg5[%c0_90, %c0_91, %c800], %194 {strides = array<i32>} : memref<1x8x1024xbf16, #tpu.memory_space<vmem>>, vector<1x8x32xbf16>,
    %195 = vector.extract_strided_slice %46 {offsets = [0, 884], sizes = [8, 32], strides = [1, 1]} : vector<8x1088xf32> to vector<8x32xf32>
    %196 = arith.truncf %195 : vector<8x32xf32> to vector<8x32xbf16>
    %c0_92 = arith.constant 0 : index
    %c0_93 = arith.constant 0 : index
    %c832 = arith.constant 832 : index
    %197 = vector.load %arg5[%c0_92, %c0_93, %c832] : memref<1x8x1024xbf16, #tpu.memory_space<vmem>>, vector<1x8x32xbf16>
    %198 = vector.shape_cast %197 : vector<1x8x32xbf16> to vector<8x32xbf16>
    %199 = vector.shape_cast %196 : vector<8x32xbf16> to vector<1x8x32xbf16>
    tpu.vector_store %arg5[%c0_92, %c0_93, %c832], %199 {strides = array<i32>} : memref<1x8x1024xbf16, #tpu.memory_space<vmem>>, vector<1x8x32xbf16>,
    %200 = vector.extract_strided_slice %46 {offsets = [0, 918], sizes = [8, 32], strides = [1, 1]} : vector<8x1088xf32> to vector<8x32xf32>
    %201 = arith.truncf %200 : vector<8x32xf32> to vector<8x32xbf16>
    %c0_94 = arith.constant 0 : index
    %c0_95 = arith.constant 0 : index
    %c864 = arith.constant 864 : index
    %202 = vector.load %arg5[%c0_94, %c0_95, %c864] : memref<1x8x1024xbf16, #tpu.memory_space<vmem>>, vector<1x8x32xbf16>
    %203 = vector.shape_cast %202 : vector<1x8x32xbf16> to vector<8x32xbf16>
    %204 = vector.shape_cast %201 : vector<8x32xbf16> to vector<1x8x32xbf16>
    tpu.vector_store %arg5[%c0_94, %c0_95, %c864], %204 {strides = array<i32>} : memref<1x8x1024xbf16, #tpu.memory_space<vmem>>, vector<1x8x32xbf16>,
    %205 = vector.extract_strided_slice %46 {offsets = [0, 952], sizes = [8, 32], strides = [1, 1]} : vector<8x1088xf32> to vector<8x32xf32>
    %206 = arith.truncf %205 : vector<8x32xf32> to vector<8x32xbf16>
    %c0_96 = arith.constant 0 : index
    %c0_97 = arith.constant 0 : index
    %c896 = arith.constant 896 : index
    %207 = vector.load %arg5[%c0_96, %c0_97, %c896] : memref<1x8x1024xbf16, #tpu.memory_space<vmem>>, vector<1x8x32xbf16>
    %208 = vector.shape_cast %207 : vector<1x8x32xbf16> to vector<8x32xbf16>
    %209 = vector.shape_cast %206 : vector<8x32xbf16> to vector<1x8x32xbf16>
    tpu.vector_store %arg5[%c0_96, %c0_97, %c896], %209 {strides = array<i32>} : memref<1x8x1024xbf16, #tpu.memory_space<vmem>>, vector<1x8x32xbf16>,
    %210 = vector.extract_strided_slice %46 {offsets = [0, 986], sizes = [8, 32], strides = [1, 1]} : vector<8x1088xf32> to vector<8x32xf32>
    %211 = arith.truncf %210 : vector<8x32xf32> to vector<8x32xbf16>
    %c0_98 = arith.constant 0 : index
    %c0_99 = arith.constant 0 : index
    %c928 = arith.constant 928 : index
    %212 = vector.load %arg5[%c0_98, %c0_99, %c928] : memref<1x8x1024xbf16, #tpu.memory_space<vmem>>, vector<1x8x32xbf16>
    %213 = vector.shape_cast %212 : vector<1x8x32xbf16> to vector<8x32xbf16>
    %214 = vector.shape_cast %211 : vector<8x32xbf16> to vector<1x8x32xbf16>
    tpu.vector_store %arg5[%c0_98, %c0_99, %c928], %214 {strides = array<i32>} : memref<1x8x1024xbf16, #tpu.memory_space<vmem>>, vector<1x8x32xbf16>,
    %215 = vector.extract_strided_slice %46 {offsets = [0, 1020], sizes = [8, 32], strides = [1, 1]} : vector<8x1088xf32> to vector<8x32xf32>
    %216 = arith.truncf %215 : vector<8x32xf32> to vector<8x32xbf16>
    %c0_100 = arith.constant 0 : index
    %c0_101 = arith.constant 0 : index
    %c960 = arith.constant 960 : index
    %217 = vector.load %arg5[%c0_100, %c0_101, %c960] : memref<1x8x1024xbf16, #tpu.memory_space<vmem>>, vector<1x8x32xbf16>
    %218 = vector.shape_cast %217 : vector<1x8x32xbf16> to vector<8x32xbf16>
    %219 = vector.shape_cast %216 : vector<8x32xbf16> to vector<1x8x32xbf16>
    tpu.vector_store %arg5[%c0_100, %c0_101, %c960], %219 {strides = array<i32>} : memref<1x8x1024xbf16, #tpu.memory_space<vmem>>, vector<1x8x32xbf16>,
    %220 = vector.extract_strided_slice %46 {offsets = [0, 1054], sizes = [8, 32], strides = [1, 1]} : vector<8x1088xf32> to vector<8x32xf32>
    %221 = arith.truncf %220 : vector<8x32xf32> to vector<8x32xbf16>
    %c0_102 = arith.constant 0 : index
    %c0_103 = arith.constant 0 : index
    %c992 = arith.constant 992 : index
    %222 = vector.load %arg5[%c0_102, %c0_103, %c992] : memref<1x8x1024xbf16, #tpu.memory_space<vmem>>, vector<1x8x32xbf16>
    %223 = vector.shape_cast %222 : vector<1x8x32xbf16> to vector<8x32xbf16>
    %224 = vector.shape_cast %221 : vector<8x32xbf16> to vector<1x8x32xbf16>
    tpu.vector_store %arg5[%c0_102, %c0_103, %c992], %224 {strides = array<i32>} : memref<1x8x1024xbf16, #tpu.memory_space<vmem>>, vector<1x8x32xbf16>,
    return
  }
  func.func @transform_0(%arg0: i32) -> (i32, i32, i32) {
    %c0_i32 = arith.constant 0 : i32
    %c0_i32_0 = arith.constant 0 : i32
    %c0_i32_1 = arith.constant 0 : i32
    return %arg0, %c0_i32, %c0_i32_0 : i32, i32, i32
  }
  func.func @transform_1(%arg0: i32) -> (i32, i32, i32) {
    %c0_i32 = arith.constant 0 : i32
    %c0_i32_0 = arith.constant 0 : i32
    %c0_i32_1 = arith.constant 0 : i32
    %c0_i32_2 = arith.constant 0 : i32
    return %c0_i32, %c0_i32_0, %c0_i32_1 : i32, i32, i32
  }
  func.func @transform_2(%arg0: i32) -> (i32, i32) {
    %c0_i32 = arith.constant 0 : i32
    %c0_i32_0 = arith.constant 0 : i32
    %c0_i32_1 = arith.constant 0 : i32
    return %c0_i32, %c0_i32_0 : i32, i32
  }
  func.func @transform_3(%arg0: i32) -> (i32, i32) {
    %c0_i32 = arith.constant 0 : i32
    %c0_i32_0 = arith.constant 0 : i32
    %c0_i32_1 = arith.constant 0 : i32
    return %c0_i32, %c0_i32_0 : i32, i32
  }
  func.func @transform_4(%arg0: i32) -> (i32, i32, i32) {
    %c0_i32 = arith.constant 0 : i32
    %c0_i32_0 = arith.constant 0 : i32
    %c0_i32_1 = arith.constant 0 : i32
    return %arg0, %c0_i32, %c0_i32_0 : i32, i32, i32
  }
  func.func @transform_5(%arg0: i32) -> (i32, i32, i32) {
    %c0_i32 = arith.constant 0 : i32
    %c0_i32_0 = arith.constant 0 : i32
    %c0_i32_1 = arith.constant 0 : i32
    return %arg0, %c0_i32, %c0_i32_0 : i32, i32, i32
  }
}

module attributes {stable_mosaic.version = 11 : i64} {
  func.func @_bn_relu_kernel(%arg0: i32, %arg1: i32, %arg2: memref<1x8x1024xbf16, #tpu.memory_space<vmem>>, %arg3: memref<8x1xf32, #tpu.memory_space<vmem>>, %arg4: memref<8x1xf32, #tpu.memory_space<vmem>>, %arg5: memref<1x8x1024xf32, #tpu.memory_space<vmem>>) attributes {dimension_semantics = [#tpu.dimension_semantics<parallel>, #tpu.dimension_semantics<parallel>], iteration_bounds = array<i64: 2, 1>, scalar_prefetch = 0 : i64, scratch_operands = 0 : i64, tpu.core_type = #tpu.core_type<tc>, window_params = [{transform_indices = @transform_0, window_bounds = array<i64: 1, 8, 1024>}, {pipeline_mode = #tpu.pipeline_mode<synchronous>, transform_indices = @transform_1, window_bounds = array<i64: 8, 1>}, {pipeline_mode = #tpu.pipeline_mode<synchronous>, transform_indices = @transform_2, window_bounds = array<i64: 8, 1>}, {transform_indices = @transform_3, window_bounds = array<i64: 1, 8, 1024>}]} {
    %c0 = arith.constant 0 : index
    %c0_0 = arith.constant 0 : index
    %c0_1 = arith.constant 0 : index
    %0 = vector.load %arg2[%c0, %c0_0, %c0_1] : memref<1x8x1024xbf16, #tpu.memory_space<vmem>>, vector<1x8x1024xbf16>
    %1 = vector.shape_cast %0 : vector<1x8x1024xbf16> to vector<8x1024xbf16>
    %2 = arith.extf %1 : vector<8x1024xbf16> to vector<8x1024xf32>
    %c0_2 = arith.constant 0 : index
    %c0_3 = arith.constant 0 : index
    %3 = vector.load %arg3[%c0_2, %c0_3] : memref<8x1xf32, #tpu.memory_space<vmem>>, vector<8x1xf32>
    %4 = vector.broadcast %3 : vector<8x1xf32> to vector<8x1024xf32>
    %5 = arith.mulf %2, %4 : vector<8x1024xf32>
    %c0_4 = arith.constant 0 : index
    %c0_5 = arith.constant 0 : index
    %6 = vector.load %arg4[%c0_4, %c0_5] : memref<8x1xf32, #tpu.memory_space<vmem>>, vector<8x1xf32>
    %7 = vector.broadcast %6 : vector<8x1xf32> to vector<8x1024xf32>
    %8 = arith.addf %5, %7 : vector<8x1024xf32>
    %cst = arith.constant 0.000000e+00 : f32
    %9 = vector.broadcast %cst : f32 to vector<8x1024xf32>
    %10 = arith.maximumf %8, %9 : vector<8x1024xf32>
    %c0_6 = arith.constant 0 : index
    %c0_7 = arith.constant 0 : index
    %c0_8 = arith.constant 0 : index
    %11 = vector.load %arg5[%c0_6, %c0_7, %c0_8] : memref<1x8x1024xf32, #tpu.memory_space<vmem>>, vector<1x8x1024xf32>
    %12 = vector.shape_cast %11 : vector<1x8x1024xf32> to vector<8x1024xf32>
    %13 = vector.shape_cast %10 : vector<8x1024xf32> to vector<1x8x1024xf32>
    tpu.vector_store %arg5[%c0_6, %c0_7, %c0_8], %13 {strides = array<i32>} : memref<1x8x1024xf32, #tpu.memory_space<vmem>>, vector<1x8x1024xf32>,
    return
  }
  func.func @transform_0(%arg0: i32, %arg1: i32) -> (i32, i32, i32) {
    %c0_i32 = arith.constant 0 : i32
    %c0_i32_0 = arith.constant 0 : i32
    return %arg0, %c0_i32, %arg1 : i32, i32, i32
  }
  func.func @transform_1(%arg0: i32, %arg1: i32) -> (i32, i32) {
    %c0_i32 = arith.constant 0 : i32
    %c0_i32_0 = arith.constant 0 : i32
    %c0_i32_1 = arith.constant 0 : i32
    return %c0_i32, %c0_i32_0 : i32, i32
  }
  func.func @transform_2(%arg0: i32, %arg1: i32) -> (i32, i32) {
    %c0_i32 = arith.constant 0 : i32
    %c0_i32_0 = arith.constant 0 : i32
    %c0_i32_1 = arith.constant 0 : i32
    return %c0_i32, %c0_i32_0 : i32, i32
  }
  func.func @transform_3(%arg0: i32, %arg1: i32) -> (i32, i32, i32) {
    %c0_i32 = arith.constant 0 : i32
    %c0_i32_0 = arith.constant 0 : i32
    return %arg0, %c0_i32, %arg1 : i32, i32, i32
  }
}

</mosaic_0001>

<bundles_post_ra>
// kernel: deconv2d_block.3
= control target key start
LH: loop header
LB: loop body
LE: loop exit
PB: predicated region body
PF: predicated region fallthrough
CT: control target
= control target key end

     0   :  { %s520_s12 = smov 0   ;;  %s522_s13 = smov 0   ;;  %s588_s0 = inlined_call_operand.vmem [shape: bf16[4,512], index: 0, kind: input, shape index: {}]   ;;  %s589_s1 = inlined_call_operand.vmem [shape: bf16[32,4], index: 1, kind: input, shape index: {}]   ;;  %s590_s2 = inlined_call_operand.vmem [shape: f32[32,1], index: 2, kind: input, shape index: {}]   ;;  %s591_s3 = inlined_call_operand.vmem [shape: bf16[32,512], index: 3, kind: output, shape index: {}]  }
   0x1   :  { %s524_s14 = smov 0  }
   0x2 LB: > { %s533_s15 = sadd.s32 4294967295, %s497_s14   ;;  %s535_s16 = sadd.s32 1, %s497_s14   ;;  %s497_s14 = sphi %s524_s14, %s595_s14   ;;  %s493_s13 = sphi %s522_s13, %s594_s13   ;;  %s489_s12 = sphi %s520_s12, %s593_s12  }
   0x3   : > { %s85_s17 = ssub.s32 %s497_s14, %s535_s16  ;;  %s88_s18 = sadd.s32 1, %s493_s13 }
   0x4   : > { %p86_p0 = scmp.eq.s32.totalorder %s85_s17, 0  ;;  %p98_p1 = scmp.ne.s32.totalorder %s493_s13, %s489_s12 }
   0x5   : > { %p99_p2 = scmp.eq.s32.totalorder %s533_s15, 1  ;;  %p420_p3 = scmp.ge.s32.totalorder %s497_s14, 1 }
   0x6   : > { %s543_s19 = scalar_select %p86_p0, %s493_s13, %s88_s18  }
   0x7   : > { %p545_p4 = por %p99_p2, %p98_p1  ;;  %p138_p5 = scmp.lt.s32.totalorder %s497_s14, 3 }
   0x9   : > { %p139_p6 = pnand %p420_p3, %p138_p5 }
   0xa   : > { %s422_s21 = sshll.u32 (!%p139_p6), %s533_s15, 1  ;;  %v499_v0 = vmov (!%p139_p6), 0   ;;  %v176_v1 = vld [vmem:[%s590_s2 + $0x10] sm:$0xff] (!%p139_p6)  ;;  %v174_v2 = vld [vmem:[%s590_s2] sm:$0xff] (!%p139_p6)  ;;  %v177_v3 = vld [vmem:[%s590_s2 + $0x18] sm:$0xff] (!%p139_p6)  ;;  %vm224_vm0 = vcmask (!%p139_p6), 1041408  }
   0xb   : > { %142 = sbr.rel (%p139_p6) target bundleno = 256 (0x100), region = 32  ;;  %p162_p7 = scmp.lt.s32.totalorder (!%p139_p6), %s422_s21, 3  ;;  %263 = vmatprep.mubr.bf16.mxu0 (!%p139_p6), %v499_v0  ;;  %273 = vmatprep.mubr.bf16.mxu1 (!%p139_p6), %v499_v0  ;;  %v175_v4 = vld [vmem:[%s590_s2 + $0x8] sm:$0xff] (!%p139_p6)  ;;  %v473_v8 = vld [vmem:[%s589_s1] sm:$0xff] (!%p139_p6)   ;;  %vm217_vm1 = vcmask (!%p139_p6), 31744  }
   0xc   : > { %472 = vset.pattern.permute.xlu1 (!%p139_p6), %v499_v0  ;;  %471 = vset.pattern.permute.xlu0 (!%p139_p6), %v499_v0  ;;  %v474_v9 = vld [vmem:[%s589_s1 + $0x8] sm:$0xff] (!%p139_p6)   ;;  %s158_s11 = sand.u32 (!%p139_p6), 1, %s489_s12  }
   0xd   : > { %190 = vperm.xlu1 (!%p139_p6), %472, %v176_v1   ;;  %180 = vperm.xlu0 (!%p139_p6), %471, %v174_v2   ;;  %s421_s14 = sshll.u32 (!%p139_p6), %s158_s11, 5 }
   0xe   : > { %s160_s12 = scalar_lea.vmem (!%p139_p6), [#allocation2], %s421_s14 }
  0x11   : > { %195 = vperm.xlu1 (!%p139_p6), %472, %v177_v3   ;;  %185 = vperm.xlu0 (!%p139_p6), %471, %v175_v4  }
  0x12   : > { %s597_s21 = smov (!%p162_p7, %s422_s21), 3  ;;  %s443_s17 = sshll.u32 (%p545_p4), %s533_s15, 3 }
  0x13   : > { %s423_s28 = sshll.u32 %s597_s21, 1  ;;  %s321_s22 = scalar_lea.vmem (%p545_p4), %s591_s3, %s443_s17 }
  0x14   : > { %s165_s6 = scalar_lea.vmem %s588_s0, %s423_s28 }
  0x15   : > { %v426_v5 = vld.sshfl [vmem:[%s165_s6] sm:$0x33 pattern:$0x76325410] }
  0x16   : > { %v216_v6 = vcombine.high %v426_v5, %v426_v5  ;;  %v226_v7 = vsel %vm224_vm0, %v426_v5, 0 }
  0x18   : > { %427 = vmatprep.subr.msk.bf16.mxu0 %vm224_vm0, %v216_v6  ;;  %444 = vmatprep.subr.msk.bf16.mxu1 %vm224_vm0, %v216_v6 }
  0x19   : > { %232 = vmatpush1.bf16.msra.mxu0 %v226_v7  ;;  %445 = vmatpush1.bf16.msra.mxu1 %v226_v7 }
  0x1c   : > { %428 = vmatmul.mubr.msk.bf16.vlgmr.msra.gmra.mrb[0].mxu0 %vm217_vm1, %v473_v8  ;;  %429 = vmatmul.mubr.msk.bf16.vlgmr.msra.gmra.mrb[0].mxu1 %vm217_vm1, %v474_v9 }
  0x8c   : > { %v191_v10 = vpop.permute.xlu1 %190  ;;  %v181_v11 = vpop.permute.xlu0 %180 }
  0x90   : > { %v196_v12 = vpop.permute.xlu1 %195  ;;  %v186_v13 = vpop.permute.xlu0 %185 }
  0xef   : > { %v265_v14 = vpop.f32.mrb[0].mxu0  ;;  %v275_v15 = vpop.f32.mrb[0].mxu1 }
  0xf0   : > { %v266_v16 = vadd.f32 %v265_v14, %v181_v11  ;;  %v276_v17 = vadd.f32 %v275_v15, %v191_v10  ;;  %v267_v18 = vpop.f32.mrb[1].mxu0  ;;  %v277_v19 = vpop.f32.mrb[1].mxu1 }
  0xf1   : > { %v268_v20 = vadd.f32 %v267_v18, %v181_v11  ;;  %v278_v21 = vadd.f32 %v277_v19, %v191_v10  ;;  %v269_v22 = vpop.f32.mrb[2].mxu0  ;;  %v279_v23 = vpop.f32.mrb[2].mxu1  ;;  %318 = sbr.rel (!%p545_p4) target bundleno = 256 (0x100), region = 36 }
  0xf2   : > { %v270_v24 = vadd.f32 %v269_v22, %v186_v13  ;;  %v280_v25 = vadd.f32 %v279_v23, %v196_v12  ;;  %v271_v26 = vpop.f32.mrb[3].mxu0  ;;  %v281_v27 = vpop.f32.mrb[3].mxu1 }
  0xf3   : > { %v439_v28 = vpack.c.bf16 %v268_v20, %v266_v16  ;;  %v441_v29 = vpack.c.bf16 %v278_v21, %v276_v17  ;;  %v272_v30 = vadd.f32 %v271_v26, %v186_v13  ;;  %v282_v31 = vadd.f32 %v281_v27, %v196_v12 }
  0xf5   : > { %308 = vst [vmem:[%s160_s12] sm:$0xff] %v439_v28  ;;  %310 = vst [vmem:[%s160_s12 + $0x10] sm:$0xff] %v441_v29  ;;  %v440_v32 = vpack.c.bf16 %v272_v30, %v270_v24  ;;  %v442_v33 = vpack.c.bf16 %v282_v31, %v280_v25 }
  0xf7   : > { %309 = vst [vmem:[%s160_s12 + $0x8] sm:$0xff] %v440_v32  ;;  %311 = vst [vmem:[%s160_s12 + $0x18] sm:$0xff] %v442_v33 }
  0xfc   : > { %v355_v34 = vld [vmem:[%s160_s12] sm:$0xff]  ;;  %v359_v36 = vld [vmem:[%s160_s12 + $0x10] sm:$0xff] }
  0xfd   : > { %356 = vst [vmem:[%s321_s22] sm:$0xff] %v355_v34  ;;  %360 = vst [vmem:[%s321_s22 + $0x20] sm:$0xff] %v359_v36 }
  0xfe   : > { %v357_v35 = vld [vmem:[%s160_s12 + $0x8] sm:$0xff]  ;;  %v361_v37 = vld [vmem:[%s160_s12 + $0x18] sm:$0xff] }
  0xff   : > { %358 = vst [vmem:[%s321_s22 + $0x10] sm:$0xff] %v357_v35  ;;  %362 = vst [vmem:[%s321_s22 + $0x30] sm:$0xff] %v361_v37 }
 0x100 PF: > { %p10_p8 = scmp.ge.s32.totalorder %s535_s16, 4   ;;  %s593_s12 = smov %s493_s13 }
 0x101   : > { %s594_s13 = smov %s543_s19  ;;  %s595_s14 = smov %s535_s16 }
 0x102   :  { %12 = sbr.rel (!%p10_p8) target bundleno = 2 (0x2), region = 100 }

// kernel: deconv2d_block.5
= control target key start
LH: loop header
LB: loop body
LE: loop exit
PB: predicated region body
PF: predicated region fallthrough
CT: control target
= control target key end

     0   :  { %s437_s12 = smov 0   ;;  %s439_s13 = smov 0   ;;  %s480_s0 = inlined_call_operand.vmem [shape: bf16[2,8,1024], index: 0, kind: input, shape index: {}]   ;;  %s481_s1 = inlined_call_operand.vmem [shape: f32[8,1], index: 1, kind: input, shape index: {}]   ;;  %s482_s2 = inlined_call_operand.vmem [shape: f32[8,1], index: 2, kind: input, shape index: {}]   ;;  %s483_s3 = inlined_call_operand.vmem [shape: f32[2,8,1024], index: 3, kind: output, shape index: {}]  }
   0x1   :  { %s441_s14 = smov 0  }
   0x2 LB: > { %s25_s15 = sadd.s32 1, %s410_s13  ;;  %p357_p0 = scmp.ge.s32.totalorder %s414_s14, 1  ;;  %s414_s14 = sphi %s441_s14, %s13_s14   ;;  %s410_s13 = sphi %s439_s13, %s485_s13   ;;  %s406_s12 = sphi %s437_s12, %s484_s12  }
   0x3   : > { %p27_p1 = scmp.ge.s32.totalorder %s25_s15, 2  ;;  %p158_p2 = scmp.lt.s32.totalorder %s414_s14, 3 }
   0x5   : > { %s487_s15 = smov (%p27_p1, %s25_s15), 0  ;;  %p159_p3 = pnand %p357_p0, %p158_p2 }
   0x6   : > { %v222_v0 = vld [vmem:[%s481_s1] sm:$0xff] (!%p159_p3)  ;;  %v416_v1 = vmov (!%p159_p3), 0   ;;  %p191_p4 = scmp.lt.s32.totalorder (!%p159_p3), %s406_s12, 1 }
   0x7   : > { %162 = sbr.rel (%p159_p3) target bundleno = 148 (0x94), region = 32  ;;  %391 = vset.pattern.permute.xlu0 (!%p159_p3), %v416_v1  ;;  %v236_v2 = vld [vmem:[%s482_s2] sm:$0xff] (!%p159_p3) }
   0x8   : > { %225 = vperm.xlu0 (!%p159_p3), %391, %v222_v0  }
   0xc   : > { %239 = vperm.xlu0 (!%p159_p3), %391, %v236_v2  }
   0xe   : > { %s489_s12 = smov (!%p191_p4, %s406_s12), 1 }
   0xf   : > { %s364_s20 = sshll.u32 %s489_s12, 5  ;;  %s365_s24 = sshll.u32 %s489_s12, 6 }
  0x10   : > { %s198_s23 = scalar_lea.vmem %s480_s0, %s364_s20  ;;  %s208_s27 = scalar_lea.vmem %s483_s3, %s365_s24 }
  0x11   : > { %v210_v3 = vld [vmem:[%s198_s23] sm:$0xff]  ;;  %v211_v4 = vld [vmem:[%s198_s23 + $0x8] sm:$0xff]  ;;  %v212_v5 = vld [vmem:[%s198_s23 + $0x10] sm:$0xff] }
  0x12   : > { %v213_v6 = vld [vmem:[%s198_s23 + $0x18] sm:$0xff]  ;;  %v214_v7 = vunpack.c.l.bf16 %v210_v3  ;;  %v215_v8 = vunpack.c.h.bf16 %v210_v3  ;;  %v216_v9 = vunpack.c.l.bf16 %v211_v4  ;;  %v217_v10 = vunpack.c.h.bf16 %v211_v4 }
  0x13   : > { %v218_v12 = vunpack.c.l.bf16 %v212_v5  ;;  %v219_v13 = vunpack.c.h.bf16 %v212_v5  ;;  %v220_v14 = vunpack.c.l.bf16 %v213_v6  ;;  %v221_v15 = vunpack.c.h.bf16 %v213_v6 }
  0x87   : > { %v226_v11 = vpop.permute.xlu0 %225 }
  0x88   : > { %v228_v16 = vmul.f32 %v226_v11, %v214_v7  ;;  %v229_v17 = vmul.f32 %v226_v11, %v215_v8  ;;  %v230_v18 = vmul.f32 %v226_v11, %v216_v9  ;;  %v231_v19 = vmul.f32 %v226_v11, %v217_v10 }
  0x89   : > { %v232_v21 = vmul.f32 %v226_v11, %v218_v12  ;;  %v233_v22 = vmul.f32 %v226_v11, %v219_v13  ;;  %v234_v23 = vmul.f32 %v226_v11, %v220_v14  ;;  %v235_v24 = vmul.f32 %v226_v11, %v221_v15 }
  0x8b   : > { %v240_v20 = vpop.permute.xlu0 %239 }
  0x8c   : > { %v242_v25 = vadd.f32 %v240_v20, %v228_v16  ;;  %v243_v26 = vadd.f32 %v240_v20, %v229_v17  ;;  %v244_v27 = vadd.f32 %v240_v20, %v230_v18  ;;  %v245_v28 = vadd.f32 %v240_v20, %v231_v19 }
  0x8d   : > { %v246_v29 = vadd.f32 %v240_v20, %v232_v21  ;;  %v247_v30 = vadd.f32 %v240_v20, %v233_v22  ;;  %v248_v31 = vadd.f32 %v240_v20, %v234_v23  ;;  %v249_v32 = vadd.f32 %v240_v20, %v235_v24 }
  0x8e   : > { %v250_v33 = vmax.f32 %v242_v25, 0.0  ;;  %v251_v34 = vmax.f32 %v243_v26, 0.0  ;;  %v252_v35 = vmax.f32 %v244_v27, 0.0  ;;  %v253_v36 = vmax.f32 %v245_v28, 0.0 }
  0x8f   : > { %v254_v37 = vmax.f32 %v246_v29, 0.0  ;;  %v255_v38 = vmax.f32 %v247_v30, 0.0  ;;  %v256_v39 = vmax.f32 %v248_v31, 0.0  ;;  %v257_v40 = vmax.f32 %v249_v32, 0.0 }
  0x90   : > { %258 = vst [vmem:[%s208_s27] sm:$0xff] %v250_v33  ;;  %259 = vst [vmem:[%s208_s27 + $0x8] sm:$0xff] %v251_v34 }
  0x91   : > { %260 = vst [vmem:[%s208_s27 + $0x10] sm:$0xff] %v252_v35  ;;  %261 = vst [vmem:[%s208_s27 + $0x18] sm:$0xff] %v253_v36 }
  0x92   : > { %262 = vst [vmem:[%s208_s27 + $0x20] sm:$0xff] %v254_v37  ;;  %263 = vst [vmem:[%s208_s27 + $0x28] sm:$0xff] %v255_v38 }
  0x93   : > { %264 = vst [vmem:[%s208_s27 + $0x30] sm:$0xff] %v256_v39  ;;  %265 = vst [vmem:[%s208_s27 + $0x38] sm:$0xff] %v257_v40 }
  0x94 PF: > { %s13_s14 = sadd.s32 1, %s414_s14   ;;  %s484_s12 = smov %s410_s13 }
  0x95   : > { %p10_p5 = scmp.ge.s32.totalorder %s13_s14, 4   ;;  %s485_s13 = smov %s487_s15 }
  0x97   :  { %12 = sbr.rel (!%p10_p5) target bundleno = 2 (0x2), region = 62 }

// kernel: deconv2d_block.4
= control target key start
LH: loop header
LB: loop body
LE: loop exit
PB: predicated region body
PF: predicated region fallthrough
CT: control target
= control target key end

     0   :  { %s2136_s18 = smov 0   ;;  %s2780_s0 = inlined_call_operand.vmem [shape: bf16[2,8,1190], index: 0, kind: input, shape index: {}]   ;;  %s2781_s1 = inlined_call_operand.vmem [shape: bf16[3,8,24], index: 1, kind: input, shape index: {}]   ;;  %s2782_s2 = inlined_call_operand.vmem [shape: f32[8,1], index: 2, kind: input, shape index: {}]   ;;  %s2783_s3 = inlined_call_operand.vmem [shape: f32[1,1088], index: 3, kind: input, shape index: {}]   ;;  %s2784_s4 = inlined_call_operand.vmem [shape: bf16[2,8,1024], index: 4, kind: output, shape index: {0}]   ;;  %s2785_s5 = inlined_call_operand.vmem [shape: f32[2,8,2], index: 5, kind: output, shape index: {1}]  }
   0x1 LB: > { %s1770_s19 = sadd.s32 4294967295, %s2068_s18   ;;  %p1774_p0 = scmp.ge.s32.totalorder %s2068_s18, 1  ;;  %s2068_s18 = sphi %s2136_s18, %s16_s18  }
   0x2   : > { %p190_p1 = scmp.lt.s32.totalorder %s2068_s18, 3 }
   0x4   : > { %p191_p2 = pnand %p1774_p0, %p190_p1 }
   0x5   : > { %p222_p3 = scmp.lt.s32.totalorder (!%p191_p2), %s1770_s19, 1  ;;  %s2070_s24 = smov (!%p191_p2), 127   ;;  %v2072_v19 = vmov (!%p191_p2), 0   ;;  %vm314_vm0 = vcmask (!%p191_p2), 1031168   ;;  %vm278_vm1 = vcmask (!%p191_p2), 1039360   ;;  %vm361_vm2 = vcmask (!%p191_p2), 1043456  }
   0x6   : > { %194 = sbr.rel (%p191_p2) target bundleno = 894 (0x37e), region = 36  ;;  %s2071_s25 = smov (!%p191_p2), 126   ;;  %421 = vmatprep.mubr.bf16.mxu1 (!%p191_p2), %v2072_v19  ;;  %503 = vmatprep.mubr.bf16.mxu0 (!%p191_p2), %v2072_v19  ;;  %vm357_vm3 = vcmask (!%p191_p2), 195584   ;;  %vm2076_vm4 = vmmov (!%p191_p2), 0   ;;  %vm649_vm5 = vcmask (!%p191_p2), 769024   ;;  %vm1103_vm6 = vcmask (!%p191_p2), 490496  }
   0x7   : > { %2061 = vset.pattern.permute.xlu0 (!%p191_p2), %v2072_v19  ;;  %s2073_s26 = smov (!%p191_p2), 94   ;;  %s2075_s29 = smov (!%p191_p2), 60   ;;  %vm1488_vm7 = vcmask (!%p191_p2), 257024   ;;  %vm1439_vm8 = vcmask (!%p191_p2), 523264   ;;  %vm1496_vm9 = vcmask (!%p191_p2), 519424   ;;  %vm1501_vm10 = vcmask (!%p191_p2), 781824  }
   0x8   : > { %s2077_s17 = smov (!%p191_p2), 92   ;;  %s2078_s22 = smov (!%p191_p2), 68   ;;  %vm1535_vm11 = vcmask (!%p191_p2), 932864   ;;  %vm1513_vm12 = vcmask (!%p191_p2), 1044224   ;;  %vm1583_vm13 = vcmask (!%p191_p2), 801792   ;;  %vm1627_vm14 = vcmask (!%p191_p2), 687104  }
   0x9   : > { %s2081_s27 = smov (!%p191_p2), 104   ;;  %s2082_s28 = smov (!%p191_p2), 96   ;;  %vm1675_vm15 = vcmask (!%p191_p2), 556032  }
   0xa   : > { %s2084_s30 = smov (!%p191_p2), 118   ;;  %s2085_s6 = smov (!%p191_p2), 84  }
   0xb   : > { %s2086_s7 = smov (!%p191_p2), 102   ;;  %s2087_s8 = smov (!%p191_p2), 76  }
   0xc   : > { %s2088_s9 = smov (!%p191_p2), 86   ;;  %s2090_s10 = smov (!%p191_p2), 70  }
   0xd   : > { %s2787_s19 = smov (!%p222_p3, %s1770_s19), 1  ;;  %s2092_s12 = smov 116  }
   0xe   : > { %s1926_s20 = smul.u32 40, %s2787_s19  ;;  %s1828_s11 = sshll.u32 %s2787_s19, 5 }
   0xf   : > { %s2551_s14 = scalar_lea.vmem %s2784_s4, %s1828_s11  ;;  %s2091_s11 = smov 114  }
  0x10   : > { %s2150_s23 = scalar_lea.vmem %s2780_s0, %s1926_s20  ;;  %s2093_s13 = smov 106  }
  0x11   : > { %v237_v0 = vld [vmem:[%s2150_s23] sm:$0xff]  ;;  %v238_v1 = vld [vmem:[%s2150_s23 + $0x8] sm:$0xff]  ;;  %v239_v6 = vld [vmem:[%s2150_s23 + $0x10] sm:$0xff]  ;;  %s2094_s15 = smov 100   ;;  %s2095_s16 = smov 98  }
  0x12   : > { %v2154_v2 = vunpack.c.h.bf16 %v237_v0  ;;  %v2156_v3 = vunpack.c.l.bf16 %v238_v1  ;;  %v2158_v4 = vunpack.c.h.bf16 %v238_v1  ;;  %v2160_v5 = vunpack.c.l.bf16 %v237_v0  ;;  %v240_v7 = vld [vmem:[%s2150_s23 + $0x18] sm:$0xff]  ;;  %v241_v18 = vld [vmem:[%s2150_s23 + $0x20] sm:$0xf]  ;;  %s2097_s20 = smov 88   ;;  %s2098_s21 = smov 72  }
  0x13   : > { %v2168_v10 = vunpack.c.l.bf16 %v239_v6  ;;  %v2170_v11 = vunpack.c.h.bf16 %v240_v7  ;;  %v2178_v14 = vunpack.c.h.bf16 %v239_v6  ;;  %v2180_v15 = vunpack.c.l.bf16 %v240_v7  ;;  %v2211_v26 = vld [vmem:[%s2150_s23 + $0x20] sm:$0xff]  ;;  %s2079_s23 = smov 120  }
  0x14   : > { %v1971_v8 = vpack.i.bf16 %v2156_v3, %v2154_v2  ;;  %v1981_v9 = vpack.i.bf16 %v2154_v2, %v2160_v5  ;;  %v1986_v12 = vpack.i.bf16 %v2158_v4, %v2156_v3  ;;  %v1976_v13 = vpack.i.bf16 %v2160_v5, %v2158_v4 }
  0x15   : > { %v1996_v16 = vpack.i.bf16 %v2168_v10, %v2170_v11  ;;  %v1991_v17 = vpack.i.bf16 %v2180_v15, %v2178_v14  ;;  %v2006_v20 = vpack.i.bf16 %v2170_v11, %v2180_v15  ;;  %v2001_v21 = vpack.i.bf16 %v2178_v14, %v2168_v10 }
  0x16   : > { %1972 = vrot.lane.b32.xlu0 %v1971_v8, %s2070_s24  ;;  %1982 = vrot.lane.b32.xlu1 %v1981_v9, %s2071_s25  ;;  %v2198_v22 = vunpack.c.l.bf16 %v241_v18  ;;  %v2026_v25 = vpack.i.bf16 %v2168_v10, %v2160_v5  ;;  %v2036_v27 = vpack.i.bf16 %v2168_v10, %v2158_v4  ;;  %v931_v28 = vunpack.c.l.bf16 %v2211_v26 }
  0x17   : > { %v2228_v30 = vunpack.c.h.bf16 %v2211_v26 }
  0x18   : > { %v2016_v23 = vpack.i.bf16 %v2160_v5, %v2198_v22  ;;  %v2011_v24 = vpack.i.bf16 %v2154_v2, %v2198_v22  ;;  %v2046_v29 = vpack.i.bf16 %v931_v28, %v2170_v11 }
  0x1a   : > { %1987 = vrot.lane.b32.xlu1 %v1986_v12, %s2071_s25  ;;  %1977 = vrot.lane.b32.xlu0 %v1976_v13, %s2070_s24 }
  0x1e   : > { %1997 = vrot.lane.b32.xlu1 %v1996_v16, %s2070_s24  ;;  %1992 = vrot.lane.b32.xlu0 %v1991_v17, %s2070_s24  ;;  %v2271_v16 = vld [vmem:[%s2781_s1] sm:$0xf] }
  0x22   : > { %2007 = vrot.lane.b32.xlu1 %v2006_v20, %s2071_s25  ;;  %2002 = vrot.lane.b32.xlu0 %v2001_v21, %s2071_s25 }
  0x26   : > { %2017 = vrot.lane.b32.xlu1 %v2016_v23, %s2071_s25  ;;  %2012 = vrot.lane.b32.xlu0 %v2011_v24, %s2070_s24 }
  0x2a   : > { %2027 = vrot.lane.b32.xlu1 %v2026_v25, %s2070_s24  ;;  %2022 = vrot.lane.b32.xlu0 %v1986_v12, %s2070_s24 }
  0x2e   : > { %2037 = vrot.lane.b32.xlu1 %v2036_v27, %s2071_s25  ;;  %2032 = vrot.lane.b32.xlu0 %v1971_v8, %s2071_s25 }
  0x32   : > { %2047 = vrot.lane.b32.xlu1 %v2046_v29, %s2070_s24  ;;  %2042 = vrot.lane.b32.xlu0 %v1991_v17, %s2070_s24 }
  0x36   : > { %2057 = vrot.lane.b32.xlu1 %v2046_v29, %s2071_s25  ;;  %2052 = vrot.lane.b32.xlu0 %v1991_v17, %s2071_s25 }
  0x3a   : > { %961 = vrot.lane.b32.xlu0 %v2228_v30, %s2070_s24  ;;  %1000 = vrot.lane.b32.xlu1 %v2228_v30, %s2071_s25  ;;  %s2080_s24 = smov 112  }
  0x88   : > { %v1973_v31 = vpop.permute.xlu0 %1972  ;;  %v1983_v32 = vpop.permute.xlu1 %1982 }
  0x89   : > { %v1975_v33 = vunpack.i.h.bf16 %v1973_v31  ;;  %v1974_v34 = vunpack.i.l.bf16 %v1973_v31  ;;  %v1985_v35 = vunpack.i.h.bf16 %v1983_v32  ;;  %v1984_v36 = vunpack.i.l.bf16 %v1983_v32 }
  0x8b   : > { %v280_v37 = vsel %vm278_vm1, %v1974_v34, %v1975_v33  ;;  %v315_v38 = vsel %vm314_vm0, %v1984_v36, %v1985_v35 }
  0x8c   : > { %v1988_v39 = vpop.permute.xlu1 %1987  ;;  %v1978_v40 = vpop.permute.xlu0 %1977  ;;  %v2237_v41 = vpack.c.bf16 %v280_v37, %v2154_v2  ;;  %v341_v45 = vpack.c.bf16 %v315_v38, %v315_v38 }
  0x8d   : > { %v1989_v42 = vunpack.i.l.bf16 %v1988_v39  ;;  %v1980_v43 = vunpack.i.h.bf16 %v1978_v40  ;;  %v1979_v44 = vunpack.i.l.bf16 %v1978_v40  ;;  %v1990_v46 = vunpack.i.h.bf16 %v1988_v39 }
  0x8e   : > { %389 = vmatprep.subr.bf16.mxu1 %v2237_v41  ;;  %v363_v58 = vsel %vm361_vm2, %v341_v45, 0 }
  0x8f   : > { %v316_v47 = vsel %vm314_vm0, %v1985_v35, %v1989_v42  ;;  %v279_v48 = vsel %vm278_vm1, %v1980_v43, %v1974_v34  ;;  %v281_v49 = vsel %vm278_vm1, %v1975_v33, %v1979_v44  ;;  %v317_v62 = vsel %vm314_vm0, %v1989_v42, %v1990_v46 }
  0x90   : > { %v2243_v50 = vpack.c.bf16 %v316_v47, %v316_v47  ;;  %v1998_v51 = vpop.permute.xlu1 %1997  ;;  %v1993_v52 = vpop.permute.xlu0 %1992  ;;  %v2246_v53 = vpack.c.bf16 %v279_v48, %v2160_v5  ;;  %v334_v54 = vpack.c.bf16 %v281_v49, %v2156_v3  ;;  %v343_v17 = vpack.c.bf16 %v317_v62, %v317_v62 }
  0x91   : > { %v2000_v55 = vunpack.i.h.bf16 %v1998_v51  ;;  %v1995_v56 = vunpack.i.h.bf16 %v1993_v52  ;;  %v1994_v57 = vunpack.i.l.bf16 %v1993_v52  ;;  %v1999_v13 = vunpack.i.l.bf16 %v1998_v51 }
  0x92   : > { %390 = vmatpush1.bf16.msra.mxu1 %v2246_v53  ;;  %617 = vrot.lane.b32.xlu1 %v334_v54, %s2073_s26  ;;  %v369_v37 = vsel %vm361_vm2, %v343_v17, 0  ;;  %v2074_v43 = vmov 0.0  }
  0x93   : > { %1779 = vmatprep.subr.msk.bf16.mxu1 %vm361_vm2, %v2243_v50  ;;  %v284_v59 = vsel %vm278_vm1, %v1994_v57, %v1995_v56  ;;  %v282_v60 = vsel %vm278_vm1, %v1979_v44, %v2000_v55  ;;  %v283_v61 = vsel %vm278_vm1, %v2000_v55, %v1994_v57  ;;  %v285_v35 = vsel %vm278_vm1, %v1995_v56, %v1999_v13 }
  0x94   : > { %v2008_v63 = vpop.permute.xlu1 %2007  ;;  %v2003_v0 = vpop.permute.xlu0 %2002  ;;  %v2259_v1 = vpack.c.bf16 %v284_v59, %v2178_v14  ;;  %v2262_v6 = vpack.c.bf16 %v282_v60, %v2158_v4  ;;  %v2265_v7 = vpack.c.bf16 %v283_v61, %v2168_v10 }
  0x95   : > { %v2009_v8 = vunpack.i.l.bf16 %v2008_v63  ;;  %v2005_v9 = vunpack.i.h.bf16 %v2003_v0  ;;  %v2004_v12 = vunpack.i.l.bf16 %v2003_v0  ;;  %v2010_v33 = vunpack.i.h.bf16 %v2008_v63 }
  0x96   : > { %392 = vmatpush1.bf16.msra.mxu1 %v363_v58  ;;  %471 = vmatprep.subr.bf16.mxu0 %v2259_v1 }
  0x97   : > { %v320_v18 = vsel %vm314_vm0, %v2005_v9, %v2009_v8  ;;  %v318_v20 = vsel %vm314_vm0, %v1990_v46, %v2004_v12  ;;  %631 = vrot.lane.b32.xlu1 %v341_v45, %s2073_s26  ;;  %430 = vmatprep.subr.bf16.mxu1 %v2262_v6  ;;  %v319_v21 = vsel %vm314_vm0, %v2004_v12, %v2005_v9 }
  0x98   : > { %v2278_v23 = vpack.c.bf16 %v320_v18, %v320_v18  ;;  %v344_v24 = vpack.c.bf16 %v318_v20, %v318_v20  ;;  %472 = vmatpush1.bf16.msra.mxu0 %v2265_v7  ;;  %v2281_v25 = vpop.permute.xlu1 %2017  ;;  %v2283_v27 = vpop.permute.xlu0 %2012  ;;  %v345_v29 = vpack.c.bf16 %v319_v21, %v319_v21  ;;  %v321_v45 = vsel %vm314_vm0, %v2009_v8, %v2010_v33 }
  0x99   : > { %v2019_v31 = vunpack.i.l.bf16 %v2281_v25  ;;  %v2014_v32 = vunpack.i.l.bf16 %v2283_v27  ;;  %1780 = vmatmul.mubr.msk.bf16.vlgmr.msra.gmra.mrb[0].mxu1 %vm357_vm3, %v2271_v16  ;;  %v347_v48 = vpack.c.bf16 %v321_v45, %v321_v45  ;;  %v2015_v56 = vunpack.i.h.bf16 %v2283_v27 }
  0x9a   : > { %1783 = vmatprep.subr.msk.bf16.mxu0 %vm361_vm2, %v2278_v23  ;;  %431 = vmatpush1.bf16.msra.mxu1 %v334_v54  ;;  %v375_v34 = vsel %vm361_vm2, %v345_v29, 0  ;;  %v2020_v62 = vunpack.i.h.bf16 %v2281_v25 }
  0x9b   : > { %v340_v36 = vpack.c.bf16 %v2014_v32, %v2198_v22  ;;  %635 = vrot.lane.b32.xlu1 %v343_v17, %s2073_s26  ;;  %1781 = vmatprep.subr.msk.bf16.mxu1 %vm361_vm2, %v344_v24  ;;  %v322_v38 = vsel %vm314_vm0, %v2010_v33, %v2019_v31  ;;  %v286_v40 = vsel %vm278_vm1, %v1999_v13, %v2014_v32  ;;  %v381_v51 = vsel %vm361_vm2, %v347_v48, 0 }
  0x9c   : > { %474 = vmatpush1.bf16.msra.mxu0 %v375_v34  ;;  %v2298_v39 = vpop.permute.xlu0 %2022  ;;  %462 = vmatprep.mubr.bf16.mxu1 %v2072_v19  ;;  %v349_v42 = vpack.c.bf16 %v2019_v31, %v2019_v31  ;;  %v338_v22 = vpack.c.bf16 %v285_v35, %v2180_v15  ;;  %v339_v44 = vpack.c.bf16 %v286_v40, %v2170_v11  ;;  %v2332_v58 = vpop.permute.xlu1 %2027 }
  0x9d   : > { %629 = vrot.lane.b32.xlu0 %v340_v36, %s2073_s26  ;;  %1855 = vmatprep.subr.bf16.mxu0 %v2074_v43  ;;  %v348_v46 = vpack.c.bf16 %v322_v38, %v322_v38  ;;  %v2024_v55 = vunpack.i.l.bf16 %v2298_v39  ;;  %v2025_v31 = vunpack.i.h.bf16 %v2298_v39  ;;  %v2029_v34 = vunpack.i.l.bf16 %v2332_v58 }
  0x9e   : > { %433 = vmatpush1.bf16.msra.mxu1 %v369_v37  ;;  %v387_v49 = vsel %vm361_vm2, %v349_v42, 0 }
  0x9f   : > { %625 = vrot.lane.b32.xlu1 %v338_v22, %s2073_s26  ;;  %1784 = vmatmul.mubr.msk.bf16.vlgmr.msra.gmra.mrb[0].mxu0 %vm357_vm3, %v2271_v16  ;;  %v964_v60 = vsel %vm278_vm1, %v2015_v56, %v2024_v55  ;;  %v963_v39 = vsel %vm278_vm1, %v2029_v34, %v2015_v56  ;;  %v351_v56 = vld [vmem:[%s2782_s2] sm:$0xff] }
  0xa0   : > { %512 = vmatprep.subr.bf16.mxu1 %v339_v44  ;;  %1856 = vmatpush3.bf16.msra.mxu0 %v340_v36  ;;  %v2310_v47 = vpop.permute.xlu0 %2032  ;;  %v1022_v61 = vpack.c.bf16 %v964_v60, %v2154_v2  ;;  %v2346_v63 = vpop.permute.xlu1 %2037 }
  0xa1   : > { %1782 = vmatmul.mubr.msk.bf16.vlgmr.msra.gmra.mrb[4].mxu1 %vm357_vm3, %v2271_v16  ;;  %647 = vrot.lane.b32.xlu0 %v349_v42, %s2073_s26  ;;  %v2039_v0 = vunpack.i.l.bf16 %v2346_v63  ;;  %v2035_v2 = vunpack.i.h.bf16 %v2310_v47 }
  0xa2   : > { %513 = vmatpush1.bf16.msra.mxu1 %v338_v22  ;;  %1857 = vmatprep.subr.bf16.mxu0 %v2074_v43  ;;  %v1021_v22 = vpack.c.bf16 %v963_v39, %v2160_v5 }
  0xa3   : > { %639 = vrot.lane.b32.xlu1 %v345_v29, %s2073_s26  ;;  %1785 = vmatprep.subr.msk.bf16.mxu1 %vm361_vm2, %v348_v46  ;;  %v1004_v13 = vsel %vm314_vm0, %v2035_v2, %v2039_v0 }
  0xa4   : > { %v2320_v52 = vpop.permute.xlu0 %2042  ;;  %1858 = vmatpush3.bf16.msra.mxu0 %v387_v49  ;;  %544 = vmatprep.mubr.bf16.mxu1 %v2072_v19  ;;  %v1033_v17 = vpack.c.bf16 %v1004_v13, %v1004_v13 }
  0xa5   : > { %1859 = vmatprep.mubr.msk.bf16.mxu0 %vm2076_vm4, %v2074_v43  ;;  %v2044_v12 = vunpack.i.l.bf16 %v2320_v52 }
  0xa6   : > { %515 = vmatpush1.bf16.msra.mxu1 %v381_v51 }
  0xa7   : > { %643 = vrot.lane.b32.xlu1 %v347_v48, %s2073_s26  ;;  %1860 = vmatmul.mubr.msk.bf16.vlgmr.msra.gmra.mrb[4].mxu0 %vm357_vm3, %v2271_v16 }
  0xa8   : > { %v2324_v54 = vpop.permute.xlu0 %2052  ;;  %737 = vmatprep.mubr.bf16.mxu0 %v2072_v19 }
  0xa9   : > { %1786 = vmatmul.mubr.msk.bf16.vlgmr.msra.gmra.mrb[8].mxu1 %vm357_vm3, %v2271_v16  ;;  %v2361_v16 = vpop.permute.xlu1 %2047 }
  0xaa   : > { %778 = vmatprep.mubr.bf16.mxu1 %v2072_v19  ;;  %v2049_v18 = vunpack.i.l.bf16 %v2361_v16  ;;  %v2050_v35 = vunpack.i.h.bf16 %v2361_v16 }
  0xab   : > { %637 = vrot.lane.b32.xlu1 %v344_v24, %s2073_s26  ;;  %v2040_v24 = vunpack.i.h.bf16 %v2346_v63 }
  0xac   : > { %v962_v57 = vpop.permute.xlu0 %961 }
  0xad   : > { %v1030_v59 = vpack.c.bf16 %v962_v57, %v2228_v30  ;;  %v2034_v30 = vunpack.i.l.bf16 %v2310_v47  ;;  %v2058_v27 = vpop.permute.xlu1 %2057  ;;  %v1005_v48 = vsel %vm314_vm0, %v2039_v0, %v2040_v24 }
  0xae   : > { %v2059_v32 = vunpack.i.l.bf16 %v2058_v27  ;;  %v2060_v36 = vunpack.i.h.bf16 %v2058_v27  ;;  %v1034_v49 = vpack.c.bf16 %v1005_v48, %v1005_v48 }
  0xaf   : > { %627 = vrot.lane.b32.xlu1 %v339_v44, %s2073_s26  ;;  %1081 = vrot.lane.b32.xlu0 %v1030_v59, %s2075_s29  ;;  %v1002_v8 = vsel %vm314_vm0, %v2020_v62, %v2034_v30 }
  0xb0   : > { %v1031_v9 = vpack.c.bf16 %v1002_v8, %v1002_v8  ;;  %v1009_v40 = vsel %vm314_vm0, %v2059_v32, %v2060_v36 }
  0xb3   : > { %1065 = vrot.lane.b32.xlu1 %v1022_v61, %s2075_s29  ;;  %615 = vrot.lane.b32.xlu0 %v2237_v41, %s2073_s26  ;;  %v2030_v41 = vunpack.i.h.bf16 %v2332_v58 }
  0xb5   : > { %v967_v20 = vsel %vm278_vm1, %v2030_v41, %v2044_v12  ;;  %v966_v45 = vsel %vm278_vm1, %v2025_v31, %v2030_v41 }
  0xb6   : > { %v1025_v21 = vpack.c.bf16 %v967_v20, %v2168_v10  ;;  %v1024_v26 = vpack.c.bf16 %v966_v45, %v2158_v4 }
  0xb7   : > { %645 = vrot.lane.b32.xlu1 %v348_v46, %s2073_s26  ;;  %613 = vrot.lane.b32.xlu0 %v2246_v53, %s2073_s26  ;;  %v2045_v53 = vunpack.i.h.bf16 %v2320_v52  ;;  %v1001_v46 = vpop.permute.xlu1 %1000  ;;  %v970_v52 = vsel %vm278_vm1, %v2049_v18, %v2050_v35 }
  0xb8   : > { %v1040_v47 = vpack.c.bf16 %v1001_v46, %v1001_v46 }
  0xb9   : > { %v969_v25 = vsel %vm278_vm1, %v2045_v53, %v2049_v18  ;;  %v968_v5 = vsel %vm278_vm1, %v2044_v12, %v2045_v53 }
  0xba   : > { %v1027_v29 = vpack.c.bf16 %v969_v25, %v2180_v15  ;;  %v965_v15 = vsel %vm278_vm1, %v2024_v55, %v2025_v31 }
  0xbb   : > { %1083 = vrot.lane.b32.xlu1 %v1031_v9, %s2075_s29  ;;  %633 = vrot.lane.b32.xlu0 %v2243_v50, %s2073_s26  ;;  %v2054_v50 = vunpack.i.l.bf16 %v2324_v54  ;;  %v1023_v38 = vpack.c.bf16 %v965_v15, %v2156_v3  ;;  %v1038_v3 = vpack.c.bf16 %v1009_v40, %v1009_v40 }
  0xbd   : > { %v1006_v10 = vsel %vm314_vm0, %v2040_v24, %v2054_v50 }
  0xbe   : > { %v1035_v33 = vpack.c.bf16 %v1006_v10, %v1006_v10 }
  0xbf   : > { %1087 = vrot.lane.b32.xlu1 %v1033_v17, %s2075_s29  ;;  %623 = vrot.lane.b32.xlu0 %v2259_v1, %s2073_s26  ;;  %v2055_v1 = vunpack.i.h.bf16 %v2324_v54  ;;  %v1028_v54 = vpack.c.bf16 %v970_v52, %v2170_v11 }
  0xc1   : > { %v1007_v51 = vsel %vm314_vm0, %v2054_v50, %v2055_v1 }
  0xc2   : > { %v1036_v4 = vpack.c.bf16 %v1007_v51, %v1007_v51  ;;  %v1798_v51 = vld [vmem:[%s2781_s1 + $0x8] sm:$0xf] }
  0xc3   : > { %1071 = vrot.lane.b32.xlu1 %v1025_v21, %s2075_s29  ;;  %621 = vrot.lane.b32.xlu0 %v2265_v7, %s2073_s26  ;;  %v1008_v7 = vsel %vm314_vm0, %v2055_v1, %v2059_v32  ;;  %v2446_v21 = vld [vmem:[%s2781_s1 + $0x4] sm:$0xf] }
  0xc4   : > { %v1037_v37 = vpack.c.bf16 %v1008_v7, %v1008_v7 }
  0xc7   : > { %1075 = vrot.lane.b32.xlu1 %v1027_v29, %s2075_s29  ;;  %641 = vrot.lane.b32.xlu0 %v2278_v23, %s2073_s26  ;;  %v971_v23 = vsel %vm278_vm1, %v2050_v35, %v962_v57  ;;  %vm1651_vm1 = vcmask 621568  }
  0xc8   : > { %v1029_v42 = vpack.c.bf16 %v971_v23, %v931_v28  ;;  %v1026_v28 = vpack.c.bf16 %v968_v5, %v2178_v14  ;;  %v1010_v14 = vsel %vm314_vm0, %v2060_v36, %v1001_v46 }
  0xc9   : > { %v1039_v55 = vpack.c.bf16 %v1010_v14, %v1010_v14 }
  0xcb   : > { %1091 = vrot.lane.b32.xlu1 %v1035_v33, %s2075_s29  ;;  %619 = vrot.lane.b32.xlu0 %v2262_v6, %s2073_s26  ;;  %v1003_v6 = vsel %vm314_vm0, %v2034_v30, %v2035_v2  ;;  %vm1603_vm0 = vcmask 752640  }
  0xcc   : > { %v1032_v44 = vpack.c.bf16 %v1003_v6, %v1003_v6 }
  0xcf   : > { %1095 = vrot.lane.b32.xlu1 %v1037_v37, %s2075_s29  ;;  %1067 = vrot.lane.b32.xlu0 %v1023_v38, %s2075_s29 }
  0xd3   : > { %1079 = vrot.lane.b32.xlu1 %v1029_v42, %s2075_s29  ;;  %1063 = vrot.lane.b32.xlu0 %v1021_v22, %s2075_s29 }
  0xd7   : > { %1097 = vrot.lane.b32.xlu1 %v1038_v3, %s2075_s29  ;;  %1085 = vrot.lane.b32.xlu0 %v1032_v44, %s2075_s29 }
  0xdb   : > { %1069 = vrot.lane.b32.xlu0 %v1024_v26, %s2075_s29  ;;  %1101 = vrot.lane.b32.xlu1 %v1040_v47, %s2075_s29 }
  0xdf   : > { %1073 = vrot.lane.b32.xlu0 %v1026_v28, %s2075_s29 }
  0xe3   : > { %1089 = vrot.lane.b32.xlu0 %v1034_v49, %s2075_s29 }
  0xe7   : > { %1093 = vrot.lane.b32.xlu0 %v1036_v4, %s2075_s29 }
  0xeb   : > { %1077 = vrot.lane.b32.xlu0 %v1028_v54, %s2075_s29 }
  0xef   : > { %1099 = vrot.lane.b32.xlu0 %v1039_v55, %s2075_s29  ;;  %s2083_s29 = smov 80  }
  0xf3   : > { %354 = vperm.xlu0 %2061, %v351_v56  }
 0x104   : > { %v618_v57 = vpop.permute.xlu1 %617 }
 0x109   : > { %v632_v58 = vpop.permute.xlu1 %631 }
 0x10d   : > { %v636_v59 = vpop.permute.xlu1 %635 }
 0x10f   : > { %v630_v62 = vpop.permute.xlu0 %629 }
 0x111   : > { %v2429_v60 = vpop.permute.xlu1 %625 }
 0x113   : > { %v2433_v30 = vpop.permute.xlu0 %647 }
 0x114   : > { %v703_v39 = vsel %vm361_vm2, %v2433_v30, 0 }
 0x115   : > { %v640_v61 = vpop.permute.xlu1 %639 }
 0x119   : > { %v2431_v11 = vpop.permute.xlu1 %643 }
 0x11d   : > { %v638_v63 = vpop.permute.xlu1 %637 }
 0x11e   : > { %v660_v36 = vsel %vm649_vm5, %v636_v59, %v638_v63  ;;  %v661_v37 = vsel %vm649_vm5, %v638_v63, %v640_v61 }
 0x11f   : > { %v685_v23 = vsel %vm361_vm2, %v660_v36, 0 }
 0x121   : > { %v628_v0 = vpop.permute.xlu1 %627  ;;  %v2435_v2 = vpop.permute.xlu0 %1081 }
 0x122   : > { %v657_v42 = vsel %vm649_vm5, %v628_v0, %v630_v62  ;;  %v656_v44 = vsel %vm649_vm5, %v2429_v60, %v628_v0 }
 0x125   : > { %v1066_v8 = vpop.permute.xlu1 %1065  ;;  %v616_v9 = vpop.permute.xlu0 %615 }
 0x126   : > { %v651_v12 = vsel %vm649_vm5, %v616_v9, %v618_v57 }
 0x127   : > { %705 = vmatprep.subr.bf16.mxu0 %v651_v12 }
 0x129   : > { %v614_v13 = vpop.permute.xlu0 %613  ;;  %v646_v41 = vpop.permute.xlu1 %645 }
 0x12a   : > { %v650_v16 = vsel %vm649_vm5, %v614_v13, %v616_v9  ;;  %v664_v45 = vsel %vm649_vm5, %v2431_v11, %v646_v41  ;;  %v665_v46 = vsel %vm649_vm5, %v646_v41, %v2433_v30 }
 0x12b   : > { %706 = vmatpush1.bf16.msra.mxu0 %v650_v16  ;;  %v697_v48 = vsel %vm361_vm2, %v664_v45, 0 }
 0x12d   : > { %v634_v17 = vpop.permute.xlu0 %633  ;;  %v1084_v24 = vpop.permute.xlu1 %1083 }
 0x12e   : > { %v658_v18 = vsel %vm649_vm5, %v632_v58, %v634_v17  ;;  %v659_v53 = vsel %vm649_vm5, %v634_v17, %v636_v59 }
 0x12f   : > { %v679_v20 = vsel %vm361_vm2, %v658_v18, 0  ;;  %1789 = vmatprep.subr.msk.bf16.mxu0 %vm361_vm2, %v659_v53 }
 0x130   : > { %708 = vmatpush1.bf16.msra.mxu0 %v679_v20 }
 0x131   : > { %v624_v50 = vpop.permute.xlu0 %623  ;;  %v2454_v31 = vpop.permute.xlu1 %1087 }
 0x132   : > { %v655_v25 = vsel %vm649_vm5, %v624_v50, %v2429_v60 }
 0x133   : > { %787 = vmatprep.subr.bf16.mxu0 %v655_v25  ;;  %1790 = vmatmul.mubr.msk.bf16.vlgmr.msra.gmra.mrb[8].mxu0 %vm357_vm3, %v2446_v21  ;;  %v1378_v25 = vlaneseq }
 0x134   : > { %819 = vmatprep.mubr.bf16.mxu0 %v2072_v19 }
 0x135   : > { %v622_v27 = vpop.permute.xlu0 %621  ;;  %v1072_v34 = vpop.permute.xlu1 %1071 }
 0x136   : > { %v654_v29 = vsel %vm649_vm5, %v622_v27, %v624_v50 }
 0x137   : > { %788 = vmatpush1.bf16.msra.mxu0 %v654_v29 }
 0x139   : > { %v642_v32 = vpop.permute.xlu0 %641  ;;  %v2475_v40 = vpop.permute.xlu1 %1075 }
 0x13a   : > { %v662_v1 = vsel %vm649_vm5, %v640_v61, %v642_v32  ;;  %v663_v10 = vsel %vm649_vm5, %v642_v32, %v2431_v11 }
 0x13b   : > { %v691_v33 = vsel %vm361_vm2, %v662_v1, 0  ;;  %1793 = vmatprep.subr.msk.bf16.mxu0 %vm361_vm2, %v663_v10 }
 0x13c   : > { %790 = vmatpush1.bf16.msra.mxu0 %v691_v33 }
 0x13d   : > { %v620_v35 = vpop.permute.xlu0 %619  ;;  %1863 = vmatprep.subr.bf16.mxu0 %v2074_v43  ;;  %v1092_v47 = vpop.permute.xlu1 %1091 }
 0x13e   : > { %v652_v7 = vsel %vm649_vm5, %v618_v57, %v620_v35  ;;  %v653_v15 = vsel %vm649_vm5, %v620_v35, %v622_v27  ;;  %vm1485_vm5 = vcmask 15360  }
 0x13f   : > { %746 = vmatprep.subr.bf16.mxu1 %v653_v15  ;;  %1794 = vmatmul.mubr.msk.bf16.vlgmr.msra.gmra.mrb[0].mxu0 %vm357_vm3, %v2446_v21 }
 0x140   : > { %1864 = vmatpush3.bf16.msra.mxu0 %v630_v62  ;;  %747 = vmatpush1.bf16.msra.mxu1 %v652_v7 }
 0x141   : > { %v1068_v38 = vpop.permute.xlu0 %1067  ;;  %1791 = vmatprep.subr.msk.bf16.mxu1 %vm361_vm2, %v661_v37  ;;  %1865 = vmatprep.subr.bf16.mxu0 %v2074_v43  ;;  %v1096_v14 = vpop.permute.xlu1 %1095 }
 0x142   : > { %1867 = vmatprep.mubr.msk.bf16.mxu0 %vm2076_vm4, %v2074_v43  ;;  %v1105_v22 = vsel %vm1103_vm6, %v1066_v8, %v1068_v38 }
 0x144   : > { %1866 = vmatpush3.bf16.msra.mxu0 %v703_v39  ;;  %749 = vmatpush1.bf16.msra.mxu1 %v685_v23 }
 0x145   : > { %v1064_v6 = vpop.permute.xlu0 %1063  ;;  %828 = vmatprep.subr.bf16.mxu1 %v657_v42  ;;  %1161 = vmatprep.subr.bf16.mxu0 %v1105_v22  ;;  %v1080_v58 = vpop.permute.xlu1 %1079 }
 0x146   : > { %v1104_v3 = vsel %vm1103_vm6, %v1064_v6, %v1066_v8  ;;  %v1112_v16 = vsel %vm1103_vm6, %v1080_v58, %v2435_v2 }
 0x147   : > { %1868 = vmatmul.mubr.msk.bf16.vlgmr.msra.gmra.mrb[4].mxu0 %vm357_vm3, %v2446_v21  ;;  %1792 = vmatmul.mubr.msk.bf16.vlgmr.msra.gmra.mrb[4].mxu1 %vm357_vm3, %v2446_v21 }
 0x148   : > { %1162 = vmatpush1.bf16.msra.mxu0 %v1104_v3  ;;  %829 = vmatpush1.bf16.msra.mxu1 %v656_v44 }
 0x149   : > { %v1086_v26 = vpop.permute.xlu0 %1085  ;;  %1795 = vmatprep.subr.msk.bf16.mxu1 %vm361_vm2, %v665_v46  ;;  %1193 = vmatprep.mubr.bf16.mxu0 %v2072_v19  ;;  %v1098_v0 = vpop.permute.xlu1 %1097 }
 0x14a   : > { %v1113_v5 = vsel %vm1103_vm6, %v1084_v24, %v1086_v26  ;;  %v1114_v28 = vsel %vm1103_vm6, %v1086_v26, %v2454_v31  ;;  %860 = vmatprep.mubr.bf16.mxu1 %v2072_v19  ;;  %v1119_v17 = vsel %vm1103_vm6, %v1096_v14, %v1098_v0 }
 0x14b   : > { %v1135_v49 = vsel %vm361_vm2, %v1113_v5, 0  ;;  %1799 = vmatprep.subr.msk.bf16.mxu0 %vm361_vm2, %v1114_v28  ;;  %v1153_v2 = vsel %vm361_vm2, %v1119_v17, 0 }
 0x14c   : > { %831 = vmatpush1.bf16.msra.mxu1 %v697_v48  ;;  %1164 = vmatpush1.bf16.msra.mxu0 %v1135_v49 }
 0x14d   : > { %v1070_v4 = vpop.permute.xlu0 %1069  ;;  %v1102_v41 = vpop.permute.xlu1 %1101 }
 0x14e   : > { %v1106_v52 = vsel %vm1103_vm6, %v1068_v38, %v1070_v4  ;;  %v1107_v54 = vsel %vm1103_vm6, %v1070_v4, %v1072_v34  ;;  %v1374_v38 = vld [vmem:[%s2783_s3] sm:$0xff] }
 0x14f   : > { %1800 = vmatmul.mubr.msk.bf16.vlgmr.msra.gmra.mrb[8].mxu0 %vm357_vm3, %v1798_v51  ;;  %1202 = vmatprep.subr.bf16.mxu1 %v1107_v54 }
 0x150   : > { %1796 = vmatmul.mubr.msk.bf16.vlgmr.msra.gmra.mrb[8].mxu1 %vm357_vm3, %v2446_v21  ;;  %1275 = vmatprep.mubr.bf16.mxu0 %v2072_v19 }
 0x151   : > { %1203 = vmatpush1.bf16.msra.mxu1 %v1106_v52  ;;  %v1074_v55 = vpop.permute.xlu0 %1073  ;;  %1234 = vmatprep.mubr.bf16.mxu1 %v2072_v19 }
 0x152   : > { %v1108_v56 = vsel %vm1103_vm6, %v1072_v34, %v1074_v55  ;;  %v1109_v57 = vsel %vm1103_vm6, %v1074_v55, %v2475_v40 }
 0x153   : > { %1243 = vmatprep.subr.bf16.mxu0 %v1109_v57 }
 0x154   : > { %1244 = vmatpush1.bf16.msra.mxu0 %v1108_v56 }
 0x155   : > { %v1090_v59 = vpop.permute.xlu0 %1089 }
 0x156   : > { %v1115_v60 = vsel %vm1103_vm6, %v2454_v31, %v1090_v59  ;;  %v1116_v61 = vsel %vm1103_vm6, %v1090_v59, %v1092_v47  ;;  %v1379_v31 = vshrl.u32 %v1378_v25, 7 }
 0x157   : > { %v1141_v62 = vsel %vm361_vm2, %v1115_v60, 0  ;;  %1801 = vmatprep.subr.msk.bf16.mxu1 %vm361_vm2, %v1116_v61 }
 0x158   : > { %1205 = vmatpush1.bf16.msra.mxu1 %v1141_v62  ;;  %v1380_v7 = vsub.s32 0, %v1379_v31  ;;  %v1384_v15 = vsub.s32 1, %v1379_v31  ;;  %v1392_v42 = vsub.s32 3, %v1379_v31  ;;  %v1396_v44 = vsub.s32 4, %v1379_v31 }
 0x159   : > { %v1094_v11 = vpop.permute.xlu0 %1093  ;;  %v1400_v52 = vsub.s32 5, %v1379_v31  ;;  %v1404_v62 = vsub.s32 6, %v1379_v31 }
 0x15a   : > { %v1117_v30 = vsel %vm1103_vm6, %v1092_v47, %v1094_v11  ;;  %v1118_v63 = vsel %vm1103_vm6, %v1094_v11, %v1096_v14  ;;  %v2565_v23 = vrot.slane %v1374_v38, %v1380_v7  ;;  %v2567_v39 = vrot.slane %v1374_v38, %v1384_v15 }
 0x15b   : > { %v1147_v8 = vsel %vm361_vm2, %v1117_v30, 0  ;;  %1802 = vmatmul.mubr.msk.bf16.vlgmr.msra.gmra.mrb[4].mxu1 %vm357_vm3, %v1798_v51  ;;  %1803 = vmatprep.subr.msk.bf16.mxu0 %vm361_vm2, %v1118_v63  ;;  %v2575_v46 = vrot.slane %v1374_v38, %v1392_v42  ;;  %v2585_v4 = vrot.slane %v1374_v38, %v1396_v44  ;;  %v2595_v61 = vrot.slane %v1374_v38, %v1400_v52 }
 0x15c   : > { %1246 = vmatpush1.bf16.msra.mxu0 %v1147_v8  ;;  %1316 = vmatprep.mubr.bf16.mxu1 %v2072_v19  ;;  %v2601_v8 = vrot.slane %v1374_v38, %v1404_v62 }
 0x15d   : > { %v1078_v9 = vpop.permute.xlu0 %1077  ;;  %1871 = vmatprep.subr.bf16.mxu0 %v2074_v43 }
 0x15e   : > { %v1110_v12 = vsel %vm1103_vm6, %v2475_v40, %v1078_v9  ;;  %v1111_v13 = vsel %vm1103_vm6, %v1078_v9, %v1080_v58  ;;  %v1388_v40 = vsub.s32 2, %v1379_v31 }
 0x15f   : > { %1804 = vmatmul.mubr.msk.bf16.vlgmr.msra.gmra.mrb[0].mxu0 %vm357_vm3, %v1798_v51  ;;  %1284 = vmatprep.subr.bf16.mxu1 %v1111_v13 }
 0x160   : > { %1872 = vmatpush3.bf16.msra.mxu0 %v1112_v16  ;;  %1285 = vmatpush1.bf16.msra.mxu1 %v1110_v12  ;;  %v2573_v3 = vrot.slane %v1374_v38, %v1388_v40 }
 0x161   : > { %v1100_v19 = vpop.permute.xlu0 %1099  ;;  %1873 = vmatprep.subr.bf16.mxu0 %v2074_v43  ;;  %1875 = vmatprep.mubr.msk.bf16.mxu0 %vm2076_vm4, %v2074_v43  ;;  %vm1483_vm4 = vcmask 7168  }
 0x162   : > { %v1120_v18 = vsel %vm1103_vm6, %v1098_v0, %v1100_v19  ;;  %v1121_v53 = vsel %vm1103_vm6, %v1100_v19, %v1102_v41  ;;  %v1408_v0 = vsub.s32 7, %v1379_v31 }
 0x163   : > { %v1159_v20 = vsel %vm361_vm2, %v1121_v53, 0  ;;  %1805 = vmatprep.subr.msk.bf16.mxu1 %vm361_vm2, %v1120_v18  ;;  %vm1510_vm2 = vcmask 998400  }
 0x164   : > { %1287 = vmatpush1.bf16.msra.mxu1 %v1153_v2  ;;  %1874 = vmatpush3.bf16.msra.mxu0 %v1159_v20  ;;  %v2605_v41 = vrot.slane %v1374_v38, %v1408_v0  ;;  %v2616_v2 = vld [vmem:[%s2783_s3 + $0x8] ss:$0 sm:$0xff] }
 0x167   : > { %1806 = vmatmul.mubr.msk.bf16.vlgmr.msra.gmra.mrb[8].mxu1 %vm357_vm3, %v1798_v51  ;;  %1876 = vmatmul.mubr.msk.bf16.vlgmr.msra.gmra.mrb[4].mxu0 %vm357_vm3, %v1798_v51  ;;  %vm1559_vm3 = vcmask 867328  }
 0x16c   : > { %v423_v21 = vpop.f32.mrb[0].mxu1 }
 0x16d   : > { %v425_v24 = vpop.f32.mrb[1].mxu1 }
 0x16e   : > { %v427_v43 = vpop.f32.mrb[2].mxu1 }
 0x16f   : > { %v428_v50 = vpop.f32.mrb[3].mxu1 }
 0x172   : > { %v2541_v27 = vpop.permute.xlu0 %354 }
 0x173   : > { %v424_v29 = vadd.f32 %v423_v21, %v2541_v27  ;;  %v426_v1 = vadd.f32 %v425_v24, %v2541_v27 }
 0x222   : > { %v1195_v32 = vpop.f32.mrb[8].mxu0 }
 0x223   : > { %v2546_v10 = vadd.f32 %v1195_v32, %v424_v29  ;;  %v1197_v33 = vpop.f32.mrb[9].mxu0 }
 0x224   : > { %v2553_v34 = vadd.f32 %v1197_v33, %v426_v1  ;;  %v1199_v35 = vpop.f32.mrb[10].mxu0 }
 0x225   : > { %v1200_v36 = vpop.f32.mrb[11].mxu0  ;;  %v2557_v37 = vpack.c.bf16 %v2546_v10, %v2546_v10  ;;  %v1423_v22 = vmul.f32 %v2546_v10, %v2565_v23 }
 0x226   : > { %v1424_v6 = vmul.f32 %v2553_v34, %v2567_v39  ;;  %v1831_v35 = vpack.c.bf16 %v2553_v34, %v2553_v34 }
 0x227   : > { %1489 = vst.msk [vmem:[%s2551_s14] sm:$0xf] %vm1488_vm7, %v2557_v37 }
 0x228   : > { %v1432_v48 = vadd.f32 %v1424_v6, %v1423_v22 }
 0x22e   : > { %v1236_v45 = vpop.f32.mrb[4].mxu1 }
 0x22f   : > { %v2578_v47 = vadd.f32 %v1236_v45, %v2541_v27  ;;  %v1238_v26 = vpop.f32.mrb[5].mxu1  ;;  %v1830_v45 = vpack.c.bf16 %v2553_v34, %v2546_v10 }
 0x230   : > { %v2581_v5 = vadd.f32 %v1238_v26, %v2541_v27  ;;  %v1240_v28 = vpop.f32.mrb[6].mxu1 }
 0x231   : > { %v1425_v49 = vmul.f32 %v2578_v47, %v2573_v3  ;;  %v1241_v51 = vpop.f32.mrb[7].mxu1  ;;  %v1833_v36 = vpack.c.bf16 %v2578_v47, %v2578_v47  ;;  %v1832_v28 = vpack.c.bf16 %v2578_v47, %v2553_v34 }
 0x232   : > { %v1426_v54 = vmul.f32 %v2581_v5, %v2575_v46  ;;  %v1277_v14 = vpop.f32.mrb[0].mxu0  ;;  %v1835_v38 = vpack.c.bf16 %v2581_v5, %v2581_v5 }
 0x233   : > { %v2590_v55 = vadd.f32 %v1277_v14, %v2541_v27  ;;  %v1279_v56 = vpop.f32.mrb[1].mxu0  ;;  %v1433_v57 = vadd.f32 %v1432_v48, %v1425_v49  ;;  %v1834_v48 = vpack.c.bf16 %v2581_v5, %v2578_v47 }
 0x234   : > { %v2593_v58 = vadd.f32 %v1279_v56, %v2541_v27  ;;  %v1281_v59 = vpop.f32.mrb[2].mxu0 }
 0x235   : > { %v1282_v60 = vpop.f32.mrb[3].mxu0  ;;  %v1427_v11 = vmul.f32 %v2590_v55, %v2585_v4  ;;  %v1434_v30 = vadd.f32 %v1433_v57, %v1426_v54  ;;  %v1837_v40 = vpack.c.bf16 %v2590_v55, %v2590_v55  ;;  %v1836_v49 = vpack.c.bf16 %v2590_v55, %v2581_v5 }
 0x236   : > { %v1838_v63 = vpack.c.bf16 %v2593_v58, %v2590_v55  ;;  %v1428_v9 = vmul.f32 %v2593_v58, %v2595_v61  ;;  %v1839_v44 = vpack.c.bf16 %v2593_v58, %v2593_v58 }
 0x237   : > { %v1435_v12 = vadd.f32 %v1434_v30, %v1427_v11 }
 0x238   : > { %1600 = vrot.lane.b32.xlu0 %v1838_v63, %s2077_s17  ;;  %s2096_s17 = smov 82  }
 0x239   : > { %v1436_v29 = vadd.f32 %v1435_v12, %v1428_v9 }
 0x23a   : > { %v1318_v13 = vpop.f32.mrb[8].mxu1  ;;  %v1359_v16 = vpop.f32.mrb[4].mxu0 }
 0x23b   : > { %v2608_v17 = vadd.f32 %v1318_v13, %v2541_v27  ;;  %v2611_v19 = vadd.f32 %v1359_v16, %v2541_v27  ;;  %v1320_v18 = vpop.f32.mrb[9].mxu1  ;;  %v1877_v53 = vpop.f32.mrb[5].mxu0 }
 0x23c   : > { %v2619_v20 = vadd.f32 %v1320_v18, %v2541_v27  ;;  %v1322_v21 = vpop.f32.mrb[10].mxu1  ;;  %v1362_v24 = vpop.f32.mrb[6].mxu0 }
 0x23d   : > { %v1323_v43 = vpop.f32.mrb[11].mxu1  ;;  %v1878_v50 = vpop.f32.mrb[7].mxu0  ;;  %v1429_v25 = vmul.f32 %v2608_v17, %v2601_v8  ;;  %v1431_v1 = vmul.f32 %v2611_v19, %v2616_v2  ;;  %v1841_v42 = vpack.c.bf16 %v2608_v17, %v2608_v17  ;;  %v1840_v22 = vpack.c.bf16 %v2608_v17, %v2593_v58 }
 0x23e   : > { %v1844_v31 = vpack.c.bf16 %v2611_v19, %v2619_v20  ;;  %v1430_v32 = vmul.f32 %v2619_v20, %v2605_v41  ;;  %v1842_v6 = vpack.c.bf16 %v2619_v20, %v2608_v17  ;;  %v1843_v26 = vpack.c.bf16 %v2619_v20, %v2619_v20 }
 0x23f   : > { %v1437_v33 = vadd.f32 %v1436_v29, %v1429_v25  ;;  %v1440_v7 = vsel %vm1439_vm8, %v1431_v1, 0.0 }
 0x240   : > { %1672 = vrot.lane.b32.xlu0 %v1844_v31, %s2078_s22  ;;  %s2099_s22 = smov 110  }
 0x241   : > { %v1438_v27 = vadd.f32 %v1437_v33, %v1430_v32 }
 0x243   : > { %v1441_v15 = vadd.f32 %v1440_v7, %v1438_v27 }
 0x244   : > { %1516 = vrot.lane.b32.xlu0 %v1831_v35, %s2079_s23  ;;  %s2100_s23 = smov 78  }
 0x245   : > { %1442 = vadd.xlane.f32.xlu1 %v1441_v15 }
 0x248   : > { %1540 = vrot.lane.b32.xlu0 %v1833_v36, %s2080_s24  ;;  %s2101_s24 = smov 124  }
 0x24c   : > { %1564 = vrot.lane.b32.xlu0 %v1835_v38, %s2081_s27  ;;  %s2102_s27 = smov 108  }
 0x250   : > { %1588 = vrot.lane.b32.xlu0 %v1837_v40, %s2082_s28  ;;  %s2103_s28 = smov 90  }
 0x254   : > { %1636 = vrot.lane.b32.xlu0 %v1841_v42, %s2083_s29  ;;  %s2104_s29 = smov 74  }
 0x256   : > { %1493 = vrot.lane.b32.xlu1 %v2557_v37, %s2071_s25  ;;  %s2089_s25 = smov 122  }
 0x258   : > { %1520 = vrot.lane.b32.xlu0 %v1831_v35, %s2084_s30  ;;  %s1778_s30 = sshll.u32 %s2787_s19, 3 }
 0x25a   : > { %1624 = vrot.lane.b32.xlu1 %v1840_v22, %s2085_s6 }
 0x25c   : > { %1568 = vrot.lane.b32.xlu0 %v1835_v38, %s2086_s7 }
 0x25e   : > { %1648 = vrot.lane.b32.xlu1 %v1842_v6, %s2087_s8  ;;  %s235_s8 = scalar_lea.vmem %s2785_s5, %s1778_s30 }
 0x260   : > { %1616 = vrot.lane.b32.xlu0 %v1839_v44, %s2088_s9 }
 0x262   : > { %1507 = vrot.lane.b32.xlu1 %v1830_v45, %s2089_s25 }
 0x264   : > { %1664 = vrot.lane.b32.xlu0 %v1843_v26, %s2090_s10 }
 0x266   : > { %1532 = vrot.lane.b32.xlu1 %v1832_v28, %s2091_s11 }
 0x268   : > { %1524 = vrot.lane.b32.xlu0 %v1831_v35, %s2092_s12 }
 0x26a   : > { %1556 = vrot.lane.b32.xlu1 %v1834_v48, %s2093_s13 }
 0x26c   : > { %1572 = vrot.lane.b32.xlu0 %v1835_v38, %s2094_s15 }
 0x26e   : > { %1580 = vrot.lane.b32.xlu1 %v1836_v49, %s2095_s16 }
 0x270   : > { %1632 = vrot.lane.b32.xlu0 %v1841_v42, %s2096_s17 }
 0x272   : > { %1612 = vrot.lane.b32.xlu1 %v1839_v44, %s2097_s20 }
 0x276   : > { %1660 = vrot.lane.b32.xlu1 %v1843_v26, %s2098_s21 }
 0x27a   : > { %1544 = vrot.lane.b32.xlu1 %v1833_v36, %s2099_s22 }
 0x27e   : > { %1592 = vrot.lane.b32.xlu1 %v1837_v40, %s2073_s26  ;;  %s2105_s26 = smov 66  }
 0x282   : > { %1640 = vrot.lane.b32.xlu1 %v1841_v42, %s2100_s23 }
 0x286   : > { %1498 = vrot.lane.b32.xlu1 %v2557_v37, %s2101_s24 }
 0x28a   : > { %1548 = vrot.lane.b32.xlu1 %v1833_v36, %s2102_s27 }
 0x28e   : > { %1608 = vrot.lane.b32.xlu1 %v1839_v44, %s2103_s28 }
 0x292   : > { %1656 = vrot.lane.b32.xlu1 %v1843_v26, %s2104_s29 }
 0x2aa   : > { %v2660_v51 = vpop.permute.xlu0 %1600 }
 0x2b2   : > { %v2662_v52 = vpop.permute.xlu0 %1672 }
 0x2b6   : > { %v1517_v54 = vpop.permute.xlu0 %1516 }
 0x2b7   : > { %1519 = vst.msk [vmem:[%s2551_s14 + $0x4] sm:$0xf] %vm1488_vm7, %v1517_v54 }
 0x2ba   : > { %v1541_v14 = vpop.permute.xlu0 %1540 }
 0x2bb   : > { %1543 = vst.msk [vmem:[%s2551_s14 + $0x8] sm:$0xf] %vm1488_vm7, %v1541_v14  ;;  %v1674_v14 = vrot.slane %v2662_v52, 4 }
 0x2be   : > { %v1565_v37 = vpop.permute.xlu0 %1564 }
 0x2bf   : > { %1567 = vst.msk [vmem:[%s2551_s14 + $0xc] sm:$0xf] %vm1488_vm7, %v1565_v37 }
 0x2c2   : > { %v1589_v56 = vpop.permute.xlu0 %1588 }
 0x2c3   : > { %1591 = vst.msk [vmem:[%s2551_s14 + $0x10] sm:$0xf] %vm1488_vm7, %v1589_v56 }
 0x2c6   : > { %v1637_v57 = vpop.permute.xlu0 %1636 }
 0x2c7   : > { %1639 = vst.msk [vmem:[%s2551_s14 + $0x18] sm:$0xf] %vm1488_vm7, %v1637_v57 }
 0x2ca   : > { %v1521_v59 = vpop.permute.xlu0 %1520 }
 0x2cb   : > { %1523 = vst.msk [vmem:[%s2551_s14 + $0x4] sm:$0xf] %vm1496_vm9, %v1521_v59  ;;  %v1676_v59 = vsel %vm1675_vm15, %v2662_v52, %v1674_v14  ;;  %v1845_v52 = vpack.c.bf16 %v2611_v19, %v2611_v19 }
 0x2ce   : > { %v1569_v60 = vpop.permute.xlu0 %1568 }
 0x2cf   : > { %1571 = vst.msk [vmem:[%s2551_s14 + $0xc] sm:$0xf] %vm1496_vm9, %v1569_v60 }
 0x2d2   : > { %v2678_v62 = vpop.permute.xlu0 %1616  ;;  %v1443_v11 = vpop.xlane.xlu1 %1442 }
 0x2d3   : > { %v2680_v30 = vmul.f32 0.0009765625, %v1443_v11 }
 0x2d5   : > { %v1445_v63 = vsub.f32 %v2546_v10, %v2680_v30  ;;  %v1446_v0 = vsub.f32 %v2553_v34, %v2680_v30  ;;  %v1447_v9 = vsub.f32 %v2578_v47, %v2680_v30  ;;  %v1448_v16 = vsub.f32 %v2581_v5, %v2680_v30 }
 0x2d6   : > { %v2688_v12 = vpop.permute.xlu0 %1664  ;;  %v1494_v13 = vpop.permute.xlu1 %1493  ;;  %v1449_v10 = vsub.f32 %v2590_v55, %v2680_v30  ;;  %v1450_v5 = vsub.f32 %v2593_v58, %v2680_v30  ;;  %v1452_v58 = vsub.f32 %v2619_v20, %v2680_v30 }
 0x2d7   : > { %1497 = vst.msk [vmem:[%s2551_s14] sm:$0xf] %vm1496_vm9, %v1494_v13  ;;  %v1454_v18 = vmul.f32 %v1445_v63, %v2565_v23  ;;  %v1455_v53 = vmul.f32 %v1446_v0, %v2567_v39  ;;  %v1456_v34 = vmul.f32 %v1447_v9, %v2573_v3  ;;  %v1457_v50 = vmul.f32 %v1448_v16, %v2575_v46 }
 0x2d8   : > { %v1451_v23 = vsub.f32 %v2608_v17, %v2680_v30  ;;  %v1458_v39 = vmul.f32 %v1449_v10, %v2585_v4  ;;  %v1453_v3 = vsub.f32 %v2611_v19, %v2680_v30  ;;  %v1459_v46 = vmul.f32 %v1450_v5, %v2595_v61 }
 0x2d9   : > { %v1463_v47 = vmul.f32 %v1454_v18, %v1454_v18  ;;  %v1464_v21 = vmul.f32 %v1455_v53, %v1455_v53  ;;  %v1465_v55 = vmul.f32 %v1456_v34, %v1456_v34  ;;  %v1466_v32 = vmul.f32 %v1457_v50, %v1457_v50 }
 0x2da   : > { %v1525_v24 = vpop.permute.xlu0 %1524  ;;  %v1625_v43 = vpop.permute.xlu1 %1624  ;;  %v1460_v17 = vmul.f32 %v1451_v23, %v2601_v8  ;;  %v1467_v4 = vmul.f32 %v1458_v39, %v1458_v39  ;;  %v1462_v27 = vmul.f32 %v2616_v2, %v1453_v3  ;;  %v1461_v7 = vmul.f32 %v1452_v58, %v2605_v41 }
 0x2db   : > { %1527 = vst.msk [vmem:[%s2551_s14 + $0x4] sm:$0xf] %vm1501_vm10, %v1525_v24  ;;  %v1472_v25 = vadd.f32 %v1464_v21, %v1463_v47  ;;  %v1468_v15 = vmul.f32 %v1459_v46, %v1459_v46  ;;  %v1626_v48 = vrot.slane %v1625_v43, 4 }
 0x2dc   : > { %v1469_v38 = vmul.f32 %v1460_v17, %v1460_v17  ;;  %v1471_v40 = vmul.f32 %v1462_v27, %v1462_v27  ;;  %v1470_v42 = vmul.f32 %v1461_v7, %v1461_v7 }
 0x2dd   : > { %v1473_v1 = vadd.f32 %v1472_v25, %v1465_v55  ;;  %v1628_v37 = vsel %vm1627_vm14, %v1625_v43, %v1626_v48 }
 0x2de   : > { %v1573_v29 = vpop.permute.xlu0 %1572  ;;  %v2709_v31 = vpop.permute.xlu1 %1648  ;;  %v1479_v2 = vsel %vm1439_vm8, %v1471_v40, 0.0 }
 0x2df   : > { %1575 = vst.msk [vmem:[%s2551_s14 + $0xc] sm:$0xf] %vm1501_vm10, %v1573_v29  ;;  %v1474_v33 = vadd.f32 %v1473_v1, %v1466_v32  ;;  %v1650_v0 = vrot.slane %v2709_v31, 4 }
 0x2e1   : > { %v1475_v36 = vadd.f32 %v1474_v33, %v1467_v4 }
 0x2e2   : > { %v1508_v35 = vpop.permute.xlu1 %1507  ;;  %v1633_v56 = vpop.permute.xlu0 %1632 }
 0x2e3   : > { %v1476_v20 = vadd.f32 %v1475_v36, %v1468_v15 }
 0x2e5   : > { %v1477_v22 = vadd.f32 %v1476_v20, %v1469_v38 }
 0x2e6   : > { %v1533_v61 = vpop.permute.xlu1 %1532 }
 0x2e7   : > { %v1534_v8 = vrot.slane %v1533_v61, 4  ;;  %v1478_v6 = vadd.f32 %v1477_v22, %v1470_v42 }
 0x2e9   : > { %v1536_v44 = vsel %vm1535_vm11, %v1533_v61, %v1534_v8  ;;  %v1480_v45 = vadd.f32 %v1479_v2, %v1478_v6 }
 0x2ea   : > { %1538 = vst.msk [vmem:[%s2551_s14 + $0x4] sm:$0xf] %vm1513_vm12, %v1536_v44  ;;  %v1557_v41 = vpop.permute.xlu1 %1556 }
 0x2eb   : > { %1481 = vadd.xlane.f32.xlu0 %v1480_v45  ;;  %v1558_v18 = vrot.slane %v1557_v41, 4 }
 0x2ed   : > { %v1560_v53 = vsel %vm1559_vm3, %v1557_v41, %v1558_v18 }
 0x2ee   : > { %v1581_v26 = vpop.permute.xlu1 %1580 }
 0x2ef   : > { %v1582_v28 = vrot.slane %v1581_v26, 4 }
 0x2f1   : > { %v1584_v49 = vsel %vm1583_vm13, %v1581_v26, %v1582_v28 }
 0x2f2   : > { %1586 = vst.msk [vmem:[%s2551_s14 + $0xc] sm:$0xf] %vm1513_vm12, %v1584_v49  ;;  %v1613_v54 = vpop.permute.xlu1 %1612 }
 0x2f3   : > { %1615 = vst.msk [vmem:[%s2551_s14 + $0x14] sm:$0xf] %vm1488_vm7, %v1613_v54 }
 0x2f4   : > { %1619 = vst.msk [vmem:[%s2551_s14 + $0x14] sm:$0xf] %vm1496_vm9, %v2678_v62  ;;  %v1602_v62 = vrot.slane %v2660_v51, 4 }
 0x2f5   : > { %1630 = vst.msk [vmem:[%s2551_s14 + $0x14] sm:$0xf] %vm1501_vm10, %v1628_v37 }
 0x2f6   : > { %1635 = vst.msk [vmem:[%s2551_s14 + $0x14] sm:$0xf] %vm1513_vm12, %v1633_v56  ;;  %v1661_v57 = vpop.permute.xlu1 %1660  ;;  %v1604_v63 = vsel %vm1603_vm0, %v2660_v51, %v1602_v62  ;;  %v1509_v51 = vrot.slane %v1508_v35, 4 }
 0x2f7   : > { %1663 = vst.msk [vmem:[%s2551_s14 + $0x1c] sm:$0xf] %vm1488_vm7, %v1661_v57 }
 0x2f8   : > { %1667 = vst.msk [vmem:[%s2551_s14 + $0x1c] sm:$0xf] %vm1496_vm9, %v2688_v12  ;;  %v1652_v12 = vsel %vm1651_vm1, %v2709_v31, %v1650_v0  ;;  %v1511_v16 = vsel %vm1510_vm2, %v1508_v35, %v1509_v51 }
 0x2f9   : > { %1678 = vst.msk [vmem:[%s2551_s14 + $0x1c] sm:$0xf] %vm1501_vm10, %v1676_v59 }
 0x2fa   : > { %v1545_v60 = vpop.permute.xlu1 %1544 }
 0x2fb   : > { %1547 = vst.msk [vmem:[%s2551_s14 + $0x8] sm:$0xf] %vm1496_vm9, %v1545_v60 }
 0x2fe   : > { %v1593_v11 = vpop.permute.xlu1 %1592 }
 0x2ff   : > { %1595 = vst.msk [vmem:[%s2551_s14 + $0x10] sm:$0xf] %vm1496_vm9, %v1593_v11 }
 0x300   : > { %1606 = vst.msk [vmem:[%s2551_s14 + $0x10] sm:$0xf] %vm1501_vm10, %v1604_v63 }
 0x301   : > { %1680 = vrot.lane.b32.xlu0 %v1845_v52, %s2105_s26 }
 0x302   : > { %v1641_v9 = vpop.permute.xlu1 %1640 }
 0x303   : > { %1643 = vst.msk [vmem:[%s2551_s14 + $0x18] sm:$0xf] %vm1496_vm9, %v1641_v9 }
 0x304   : > { %1654 = vst.msk [vmem:[%s2551_s14 + $0x18] sm:$0xf] %vm1501_vm10, %v1652_v12 }
 0x306   : > { %v1499_v13 = vpop.permute.xlu1 %1498 }
 0x307   : > { %1502 = vst.msk [vmem:[%s2551_s14] sm:$0xf] %vm1501_vm10, %v1499_v13 }
 0x308   : > { %1514 = vst.msk [vmem:[%s2551_s14] sm:$0xf] %vm1513_vm12, %v1511_v16 }
 0x30a   : > { %v1549_v19 = vpop.permute.xlu1 %1548 }
 0x30b   : > { %1551 = vst.msk [vmem:[%s2551_s14 + $0x8] sm:$0xf] %vm1501_vm10, %v1549_v19 }
 0x30c   : > { %1562 = vst.msk [vmem:[%s2551_s14 + $0x8] sm:$0xf] %vm1513_vm12, %v1560_v53 }
 0x30e   : > { %v1609_v10 = vpop.permute.xlu1 %1608 }
 0x30f   : > { %1611 = vst.msk [vmem:[%s2551_s14 + $0x10] sm:$0xf] %vm1513_vm12, %v1609_v10 }
 0x312   : > { %v1657_v34 = vpop.permute.xlu1 %1656 }
 0x313   : > { %1659 = vst.msk [vmem:[%s2551_s14 + $0x18] sm:$0xf] %vm1513_vm12, %v1657_v34 }
 0x378   : > { %v1482_v47 = vpop.xlane.xlu0 %1481 }
 0x379   : > { %v1484_v21 = vsel %vm1483_vm4, %v2680_v30, %v1482_v47 }
 0x37a   : > { %1486 = vst.msk [vmem:[%s235_s8] sm:$0xff] %vm1485_vm5, %v1484_v21 }
 0x37c   : > { %v1681_v24 = vpop.permute.xlu0 %1680 }
 0x37d   : > { %1683 = vst.msk [vmem:[%s2551_s14 + $0x1c] sm:$0xf] %vm1513_vm12, %v1681_v24 }
 0x37e PF: > { %s16_s18 = sadd.s32 1, %s2068_s18  }
 0x37f   : > { %p13_p4 = scmp.ge.s32.totalorder %s16_s18, 4  }
 0x381   :  { %15 = sbr.rel (!%p13_p4) target bundleno = 1 (0x1), region = 80 }

</bundles_post_ra>
